<compile_context>
chip_gen: v7x
topology: tpu7x:2x2x1
jax: 0.10.0
libtpu: 0.0.40
codegen_flags: <defaults>
</compile_context>

<pallas_src>
import functools

import jax
import jax.numpy as jnp
from jax.experimental import pallas as pl
from jax.experimental.pallas import tpu as pltpu


def _sig(x):
    # sigmoid(x) == 0.5 * tanh(0.5 * x) + 0.5  -> a single EUP (tanh) push.
    return 0.5 * jnp.tanh(0.5 * x) + 0.5


def _treelstm_kernel(h1_ref, c1_ref, h2_ref, c2_ref, w_ref, b_ref, h_ref, c_ref,
                     *, gate_dtype):
    dim = h1_ref.shape[1]

    # Fused K = 2*dim matmul: cast h1/h2 to bf16 in-kernel (no extra HBM pass
    # in the wrapper) and concat along lanes (cheap relabel when dim % 128 == 0).
    lhs = jnp.concatenate(
        [h1_ref[...].astype(jnp.bfloat16), h2_ref[...].astype(jnp.bfloat16)],
        axis=1,
    )
    all_sum = jnp.dot(lhs, w_ref[...], preferred_element_type=jnp.float32)
    all_sum = all_sum + b_ref[...]

    # Gate math in gate_dtype (f32 by default; bf16 optional on v6e/v7x).
    gs = all_sum.astype(gate_dtype)
    i_ = gs[:, 0 * dim:1 * dim]
    f1 = gs[:, 1 * dim:2 * dim]
    f2 = gs[:, 2 * dim:3 * dim]
    o_ = gs[:, 3 * dim:4 * dim]
    g_ = gs[:, 4 * dim:5 * dim]

    c1 = c1_ref[...].astype(gate_dtype)
    c2 = c2_ref[...].astype(gate_dtype)

    c = _sig(f1) * c1 + _sig(f2) * c2 + _sig(i_) * jnp.tanh(g_)
    h = _sig(o_) * jnp.tanh(c)

    h_ref[...] = h.astype(h_ref.dtype)
    c_ref[...] = c.astype(c_ref.dtype)


def _round_up(x, m):
    return ((x + m - 1) // m) * m


def _choose_bm(n, block_m):
    """Node-axis tile: even, balanced tile count (keeps v7x's two TensorCores
    busy), multiple of 8 sublanes, capped at block_m."""
    k = 1
    while _round_up(pl.cdiv(n, 2 * k), 8) > block_m:
        k += 1
    return max(8, _round_up(pl.cdiv(n, 2 * k), 8))


def _resident_spec(shape):
    # Constant index_map -> DMA'd once and reused by every node tile; never
    # changes, so single-buffer it (halves its VMEM footprint).
    index_map = lambda i: (0,) * len(shape)
    try:
        return pl.BlockSpec(shape, index_map, pipeline_mode=pl.Buffered(1))
    except TypeError:  # older JAX without pipeline_mode
        return pl.BlockSpec(shape, index_map)


def tree_lstm_forward(x1, x2, weight_t, bias, *, block_m=256,
                      gate_dtype=jnp.float32):
    """Pallas TreeLSTM cell applied to a batch of tree nodes.

    x1, x2: tuples (h, c), bare h arrays (c treated as zeros), or x2 may be None.
    weight_t: (2*dim, 5*dim)   -- transposed nn.Linear weight
    bias:     (5*dim,)
    h*, c*:   (n_nodes, dim)
    Returns (h, c), each (n_nodes, dim) in h1.dtype.
    """
    # Input normalization, same semantics as the PyTorch module.
    if not isinstance(x1, tuple):
        x1 = (x1, None)
    h1, c1 = x1
    if x2 is None:
        x2 = (jnp.zeros_like(h1), jnp.zeros_like(h1))
    elif not isinstance(x2, tuple):
        x2 = (x2, None)
    h2, c2 = x2
    if c1 is None:
        c1 = jnp.zeros_like(h1)
    if c2 is None:
        c2 = jnp.zeros_like(h2)

    n, dim = h1.shape
    out_dtype = h1.dtype

    bm = _choose_bm(n, block_m)
    grid = (pl.cdiv(n, bm),)          # partial edge block handled by Pallas masking

    # Small, grid-resident operands (the only wrapper-side casts left).
    wb = weight_t.astype(jnp.bfloat16)          # (2*dim, 5*dim) bf16 MXU weight
    b2d = bias.reshape(1, 5 * dim).astype(jnp.float32)

    # VMEM budget: single-buffered W + bias, double-buffered activation tiles,
    # fused bf16 LHS and the (bm, 5*dim) f32 gate intermediate.  2x headroom,
    # 32 MiB floor, clamped below the device's physical VMEM.
    est = (
        wb.size * wb.dtype.itemsize
        + b2d.size * b2d.dtype.itemsize
        + 2 * bm * dim * (h1.dtype.itemsize + h2.dtype.itemsize
                          + c1.dtype.itemsize + c2.dtype.itemsize)
        + 2 * bm * dim * 2 * jnp.dtype(out_dtype).itemsize   # h/c output tiles
        + bm * 2 * dim * 2                                   # bf16 fused LHS
        + bm * 5 * dim * 4                                   # f32 gate intermediate
    )
    try:
        vmem_cap = pltpu.get_tpu_info().vmem_capacity_bytes
    except Exception:
        vmem_cap = 64 * 2 ** 20     # v7x per-TC capacity = safe floor everywhere
    vmem_limit = int(min(vmem_cap - 8 * 2 ** 20, max(32 * 2 ** 20, 2 * est)))

    kernel = functools.partial(_treelstm_kernel, gate_dtype=gate_dtype)

    h_out, c_out = pl.pallas_call(
        kernel,
        out_shape=(
            jax.ShapeDtypeStruct((n, dim), out_dtype),
            jax.ShapeDtypeStruct((n, dim), out_dtype),
        ),
        grid=grid,
        in_specs=[
            pl.BlockSpec((bm, dim), lambda i: (i, 0)),   # h1
            pl.BlockSpec((bm, dim), lambda i: (i, 0)),   # c1
            pl.BlockSpec((bm, dim), lambda i: (i, 0)),   # h2
            pl.BlockSpec((bm, dim), lambda i: (i, 0)),   # c2
            _resident_spec((2 * dim, 5 * dim)),          # W  (grid-resident)
            _resident_spec((1, 5 * dim)),                # b  (grid-resident)
        ],
        out_specs=(
            pl.BlockSpec((bm, dim), lambda i: (i, 0)),
            pl.BlockSpec((bm, dim), lambda i: (i, 0)),
        ),
        compiler_params=pltpu.CompilerParams(
            dimension_semantics=("parallel",),
            vmem_limit_bytes=vmem_limit,
        ),
    )(h1, c1, h2, c2, wb, b2d)

    return h_out, c_out


# --------------------------- references / test ------------------------------

def _gates_to_hc(all_sum, c1, c2, dim):
    i_, f1, f2, o_, g_ = jnp.split(all_sum, 5, axis=1)
    c = (
        jax.nn.sigmoid(f1) * c1
        + jax.nn.sigmoid(f2) * c2
        + jax.nn.sigmoid(i_) * jnp.tanh(g_)
    )
    h = jax.nn.sigmoid(o_) * jnp.tanh(c)
    return h, c


def _reference_f32(h1, c1, h2, c2, weight_t, bias):
    concat = jnp.concatenate([h1, h2], axis=1)
    all_sum = concat @ weight_t + bias
    return _gates_to_hc(all_sum, c1, c2, h1.shape[1])


def _reference_bf16_matmul(h1, c1, h2, c2, weight_t, bias):
    # Same numerics as the kernel: bf16 matmul inputs, f32 accumulation,
    # f32 gate math.
    concat = jnp.concatenate([h1, h2], axis=1).astype(jnp.bfloat16)
    all_sum = (
        jnp.dot(concat, weight_t.astype(jnp.bfloat16),
                preferred_element_type=jnp.float32)
        + bias.astype(jnp.float32)
    )
    return _gates_to_hc(all_sum, c1, c2, h1.shape[1])


if __name__ == "__main__":
    dim = 128       # hidden size (lane-aligned)
    n_nodes = 300   # not a multiple of the tile -> exercises the masked edge block

    key = jax.random.PRNGKey(0)
    k1, k2, k3, k4, kw, kb = jax.random.split(key, 6)

    h1 = jax.random.normal(k1, (n_nodes, dim), dtype=jnp.float32)
    c1 = jax.random.normal(k2, (n_nodes, dim), dtype=jnp.float32)
    h2 = jax.random.normal(k3, (n_nodes, dim), dtype=jnp.float32)
    c2 = jax.random.normal(k4, (n_nodes, dim), dtype=jnp.float32)

    # Deterministic nn.Linear-style init: U(-1/sqrt(fan_in), 1/sqrt(fan_in)).
    fan_in = 2 * dim
    bound = 1.0 / (fan_in ** 0.5)
    weight_t = jax.random.uniform(
        kw, (2 * dim, 5 * dim), minval=-bound, maxval=bound, dtype=jnp.float32
    )
    bias = jax.random.uniform(
        kb, (5 * dim,), minval=-bound, maxval=bound, dtype=jnp.float32
    )

    h_out, c_out = tree_lstm_forward((h1, c1), (h2, c2), weight_t, bias)
    h_out = jax.block_until_ready(h_out)
    c_out = jax.block_until_ready(c_out)
    assert h_out.shape == (n_nodes, dim) and c_out.shape == (n_nodes, dim)

    # Tight check against a reference with the same bf16-matmul / f32-gate numerics.
    h_bf, c_bf = _reference_bf16_matmul(h1, c1, h2, c2, weight_t, bias)
    assert jnp.allclose(h_out, h_bf, atol=2e-3, rtol=2e-3), "h mismatch (bf16 ref)"
    assert jnp.allclose(c_out, c_bf, atol=2e-3, rtol=2e-3), "c mismatch (bf16 ref)"

    # Loose sanity check against the full-f32 reference (bf16 matmul rounding only).
    h_ref, c_ref = _reference_f32(h1, c1, h2, c2, weight_t, bias)
    assert jnp.allclose(h_out, h_ref, atol=1e-1, rtol=1e-1), "h mismatch (f32 ref)"
    assert jnp.allclose(c_out, c_ref, atol=1e-1, rtol=1e-1), "c mismatch (f32 ref)"

    # Exercise the x2=None branch of the module (right child absent).
    h_n, c_n = tree_lstm_forward((h1, c1), None, weight_t, bias)
    h_n = jax.block_until_ready(h_n)
    h_r2, c_r2 = _reference_bf16_matmul(
        h1, c1, jnp.zeros_like(h1), jnp.zeros_like(c1), weight_t, bias)
    assert jnp.allclose(h_n, h_r2, atol=2e-3, rtol=2e-3), "h mismatch (x2=None)"
    assert jnp.allclose(c_n, c_r2, atol=2e-3, rtol=2e-3), "c mismatch (x2=None)"

    print("KERNEL_OK")
</pallas_src>

<mosaic_0001>
module attributes {stable_mosaic.version = 11 : i64} {
  func.func @_treelstm_kernel(%arg0: i32, %arg1: memref<152x128xf32, #tpu.memory_space<vmem>>, %arg2: memref<152x128xf32, #tpu.memory_space<vmem>>, %arg3: memref<152x128xf32, #tpu.memory_space<vmem>>, %arg4: memref<152x128xf32, #tpu.memory_space<vmem>>, %arg5: memref<256x640xbf16, #tpu.memory_space<vmem>>, %arg6: memref<1x640xf32, #tpu.memory_space<vmem>>, %arg7: memref<152x128xf32, #tpu.memory_space<vmem>>, %arg8: memref<152x128xf32, #tpu.memory_space<vmem>>) attributes {dimension_semantics = [#tpu.dimension_semantics<parallel>], iteration_bounds = array<i64: 2>, scalar_prefetch = 0 : i64, scratch_operands = 0 : i64, tpu.core_type = #tpu.core_type<tc>, window_params = [{transform_indices = @transform_0, window_bounds = array<i64: 152, 128>}, {transform_indices = @transform_1, window_bounds = array<i64: 152, 128>}, {transform_indices = @transform_2, window_bounds = array<i64: 152, 128>}, {transform_indices = @transform_3, window_bounds = array<i64: 152, 128>}, {pipeline_mode = #tpu.pipeline_mode<synchronous>, transform_indices = @transform_4, window_bounds = array<i64: 256, 640>}, {pipeline_mode = #tpu.pipeline_mode<synchronous>, transform_indices = @transform_5, window_bounds = array<i64: 1, 640>}, {transform_indices = @transform_6, window_bounds = array<i64: 152, 128>}, {transform_indices = @transform_7, window_bounds = array<i64: 152, 128>}]} {
    %c0 = arith.constant 0 : index
    %c0_0 = arith.constant 0 : index
    %0 = vector.load %arg1[%c0, %c0_0] : memref<152x128xf32, #tpu.memory_space<vmem>>, vector<152x128xf32>
    %1 = arith.truncf %0 : vector<152x128xf32> to vector<152x128xbf16>
    %c0_1 = arith.constant 0 : index
    %c0_2 = arith.constant 0 : index
    %2 = vector.load %arg3[%c0_1, %c0_2] : memref<152x128xf32, #tpu.memory_space<vmem>>, vector<152x128xf32>
    %3 = arith.truncf %2 : vector<152x128xf32> to vector<152x128xbf16>
    %4 = tpu.concatenate %1, %3 in 1 : vector<152x128xbf16>, vector<152x128xbf16> -> vector<152x256xbf16>
    %c0_3 = arith.constant 0 : index
    %c0_4 = arith.constant 0 : index
    %5 = vector.load %arg5[%c0_3, %c0_4] : memref<256x640xbf16, #tpu.memory_space<vmem>>, vector<256x640xbf16>
    %cst = arith.constant dense<0.000000e+00> : vector<152x640xf32>
    %6 = tpu.matmul %4, %5, %cst {dimension_numbers = #tpu.dot_dimension_numbers<[1], [0], [0], [1], [0, 0, 1, 1], [], []>} : vector<152x256xbf16>, vector<256x640xbf16>, vector<152x640xf32> -> vector<152x640xf32>
    %c0_5 = arith.constant 0 : index
    %c0_6 = arith.constant 0 : index
    %7 = vector.load %arg6[%c0_5, %c0_6] : memref<1x640xf32, #tpu.memory_space<vmem>>, vector<1x640xf32>
    %8 = vector.broadcast %7 : vector<1x640xf32> to vector<152x640xf32>
    %9 = arith.addf %6, %8 : vector<152x640xf32>
    %10 = vector.extract_strided_slice %9 {offsets = [0, 0], sizes = [152, 128], strides = [1, 1]} : vector<152x640xf32> to vector<152x128xf32>
    %11 = vector.extract_strided_slice %9 {offsets = [0, 128], sizes = [152, 128], strides = [1, 1]} : vector<152x640xf32> to vector<152x128xf32>
    %12 = vector.extract_strided_slice %9 {offsets = [0, 256], sizes = [152, 128], strides = [1, 1]} : vector<152x640xf32> to vector<152x128xf32>
    %13 = vector.extract_strided_slice %9 {offsets = [0, 384], sizes = [152, 128], strides = [1, 1]} : vector<152x640xf32> to vector<152x128xf32>
    %14 = vector.extract_strided_slice %9 {offsets = [0, 512], sizes = [152, 128], strides = [1, 1]} : vector<152x640xf32> to vector<152x128xf32>
    %c0_7 = arith.constant 0 : index
    %c0_8 = arith.constant 0 : index
    %15 = vector.load %arg2[%c0_7, %c0_8] : memref<152x128xf32, #tpu.memory_space<vmem>>, vector<152x128xf32>
    %c0_9 = arith.constant 0 : index
    %c0_10 = arith.constant 0 : index
    %16 = vector.load %arg4[%c0_9, %c0_10] : memref<152x128xf32, #tpu.memory_space<vmem>>, vector<152x128xf32>
    %cst_11 = arith.constant 5.000000e-01 : f32
    %17 = vector.broadcast %cst_11 : f32 to vector<152x128xf32>
    %18 = arith.mulf %17, %11 : vector<152x128xf32>
    %19 = math.tanh %18 : vector<152x128xf32>
    %cst_12 = arith.constant 5.000000e-01 : f32
    %20 = vector.broadcast %cst_12 : f32 to vector<152x128xf32>
    %21 = arith.mulf %20, %19 : vector<152x128xf32>
    %cst_13 = arith.constant 5.000000e-01 : f32
    %22 = vector.broadcast %cst_13 : f32 to vector<152x128xf32>
    %23 = arith.addf %21, %22 : vector<152x128xf32>
    %24 = arith.mulf %23, %15 : vector<152x128xf32>
    %cst_14 = arith.constant 5.000000e-01 : f32
    %25 = vector.broadcast %cst_14 : f32 to vector<152x128xf32>
    %26 = arith.mulf %25, %12 : vector<152x128xf32>
    %27 = math.tanh %26 : vector<152x128xf32>
    %cst_15 = arith.constant 5.000000e-01 : f32
    %28 = vector.broadcast %cst_15 : f32 to vector<152x128xf32>
    %29 = arith.mulf %28, %27 : vector<152x128xf32>
    %cst_16 = arith.constant 5.000000e-01 : f32
    %30 = vector.broadcast %cst_16 : f32 to vector<152x128xf32>
    %31 = arith.addf %29, %30 : vector<152x128xf32>
    %32 = arith.mulf %31, %16 : vector<152x128xf32>
    %33 = arith.addf %24, %32 : vector<152x128xf32>
    %cst_17 = arith.constant 5.000000e-01 : f32
    %34 = vector.broadcast %cst_17 : f32 to vector<152x128xf32>
    %35 = arith.mulf %34, %10 : vector<152x128xf32>
    %36 = math.tanh %35 : vector<152x128xf32>
    %cst_18 = arith.constant 5.000000e-01 : f32
    %37 = vector.broadcast %cst_18 : f32 to vector<152x128xf32>
    %38 = arith.mulf %37, %36 : vector<152x128xf32>
    %cst_19 = arith.constant 5.000000e-01 : f32
    %39 = vector.broadcast %cst_19 : f32 to vector<152x128xf32>
    %40 = arith.addf %38, %39 : vector<152x128xf32>
    %41 = math.tanh %14 : vector<152x128xf32>
    %42 = arith.mulf %40, %41 : vector<152x128xf32>
    %43 = arith.addf %33, %42 : vector<152x128xf32>
    %cst_20 = arith.constant 5.000000e-01 : f32
    %44 = vector.broadcast %cst_20 : f32 to vector<152x128xf32>
    %45 = arith.mulf %44, %13 : vector<152x128xf32>
    %46 = math.tanh %45 : vector<152x128xf32>
    %cst_21 = arith.constant 5.000000e-01 : f32
    %47 = vector.broadcast %cst_21 : f32 to vector<152x128xf32>
    %48 = arith.mulf %47, %46 : vector<152x128xf32>
    %cst_22 = arith.constant 5.000000e-01 : f32
    %49 = vector.broadcast %cst_22 : f32 to vector<152x128xf32>
    %50 = arith.addf %48, %49 : vector<152x128xf32>
    %51 = math.tanh %43 : vector<152x128xf32>
    %52 = arith.mulf %50, %51 : vector<152x128xf32>
    %c0_23 = arith.constant 0 : index
    %c0_24 = arith.constant 0 : index
    %53 = vector.load %arg7[%c0_23, %c0_24] : memref<152x128xf32, #tpu.memory_space<vmem>>, vector<152x128xf32>
    tpu.vector_store %arg7[%c0_23, %c0_24], %52 {strides = array<i32>} : memref<152x128xf32, #tpu.memory_space<vmem>>, vector<152x128xf32>,
    %c0_25 = arith.constant 0 : index
    %c0_26 = arith.constant 0 : index
    %54 = vector.load %arg8[%c0_25, %c0_26] : memref<152x128xf32, #tpu.memory_space<vmem>>, vector<152x128xf32>
    tpu.vector_store %arg8[%c0_25, %c0_26], %43 {strides = array<i32>} : memref<152x128xf32, #tpu.memory_space<vmem>>, vector<152x128xf32>,
    return
  }
  func.func @transform_0(%arg0: i32) -> (i32, i32) {
    %c0_i32 = arith.constant 0 : i32
    %c0_i32_0 = arith.constant 0 : i32
    return %arg0, %c0_i32 : i32, i32
  }
  func.func @transform_1(%arg0: i32) -> (i32, i32) {
    %c0_i32 = arith.constant 0 : i32
    %c0_i32_0 = arith.constant 0 : i32
    return %arg0, %c0_i32 : i32, i32
  }
  func.func @transform_2(%arg0: i32) -> (i32, i32) {
    %c0_i32 = arith.constant 0 : i32
    %c0_i32_0 = arith.constant 0 : i32
    return %arg0, %c0_i32 : i32, i32
  }
  func.func @transform_3(%arg0: i32) -> (i32, i32) {
    %c0_i32 = arith.constant 0 : i32
    %c0_i32_0 = arith.constant 0 : i32
    return %arg0, %c0_i32 : i32, i32
  }
  func.func @transform_4(%arg0: i32) -> (i32, i32) {
    %c0_i32 = arith.constant 0 : i32
    %c0_i32_0 = arith.constant 0 : i32
    %c0_i32_1 = arith.constant 0 : i32
    return %c0_i32, %c0_i32_0 : i32, i32
  }
  func.func @transform_5(%arg0: i32) -> (i32, i32) {
    %c0_i32 = arith.constant 0 : i32
    %c0_i32_0 = arith.constant 0 : i32
    %c0_i32_1 = arith.constant 0 : i32
    return %c0_i32, %c0_i32_0 : i32, i32
  }
  func.func @transform_6(%arg0: i32) -> (i32, i32) {
    %c0_i32 = arith.constant 0 : i32
    %c0_i32_0 = arith.constant 0 : i32
    return %arg0, %c0_i32 : i32, i32
  }
  func.func @transform_7(%arg0: i32) -> (i32, i32) {
    %c0_i32 = arith.constant 0 : i32
    %c0_i32_0 = arith.constant 0 : i32
    return %arg0, %c0_i32 : i32, i32
  }
}

</mosaic_0001>

<bundles_post_ra>
// kernel: tpu_custom_call.1
= control target key start
LH: loop header
LB: loop body
LE: loop exit
PB: predicated region body
PF: predicated region fallthrough
CT: control target
= control target key end

     0   :  { %s4252_s0 = inlined_call_operand.hbm [shape: f32[300,128], index: 0, kind: input, shape index: {}]   ;;  %s4253_s1 = inlined_call_operand.hbm [shape: f32[300,128], index: 1, kind: input, shape index: {}]   ;;  %s4254_s2 = inlined_call_operand.hbm [shape: f32[300,128], index: 2, kind: input, shape index: {}]   ;;  %s4255_s3 = inlined_call_operand.hbm [shape: f32[300,128], index: 3, kind: input, shape index: {}]   ;;  %s4256_s4 = inlined_call_operand.hbm [shape: bf16[256,640], index: 4, kind: input, shape index: {}]   ;;  %s4257_s5 = inlined_call_operand.vmem [shape: f32[1,640], index: 5, kind: input, shape index: {}]   ;;  %s4258_s6 = inlined_call_operand.hbm [shape: f32[300,128], index: 6, kind: output, shape index: {0}]   ;;  %s4259_s7 = inlined_call_operand.hbm [shape: f32[300,128], index: 7, kind: output, shape index: {1}]  }
   0x1   :  { %4271 = sst [smem:[#allocation57_spill]] %s4253_s1 }
   0x2   :  { %4272 = sst [smem:[#allocation58_spill]] %s4256_s4 }
   0x3   :  { %13 = vsyncpa [#allocation3], 0 }
   0x4   :  { %15 = vsyncpa [#allocation3 + $0x1], 0 }
   0x5   :  { %16 = vsyncpa [#allocation6], 0 }
   0x6   :  { %18 = vsyncpa [#allocation6 + $0x1], 0 }
   0x7   :  { %19 = vsyncpa [#allocation9], 0 }
   0x8   :  { %21 = vsyncpa [#allocation9 + $0x1], 0 }
   0x9   :  { %22 = vsyncpa [#allocation4], 0 }
   0xa   :  { %24 = vsyncpa [#allocation4 + $0x1], 0 }
   0xb   :  { %25 = vsyncpa [#allocation13], 0 }
   0xc   :  { %27 = vsyncpa [#allocation13 + $0x1], 0  ;;  %s3097_s24 = smov 0   ;;  %s3099_s25 = smov 0  }
   0xd   :  { %s3101_s26 = smov 0   ;;  %s3103_s27 = smov 0  }
   0xe LB: > { %s3118_s28 = sadd.s32 4294967295, %s3042_s27   ;;  %s2164_s29 = sadd.s32 4294967294, %s3042_s27   ;;  %s3042_s27 = sphi %s3103_s27, %s4367_s27   ;;  %s3038_s26 = sphi %s3101_s26, %s4371_s26   ;;  %s3034_s25 = sphi %s3099_s25, %s4370_s25   ;;  %s3030_s24 = sphi %s3097_s24, %s4369_s24  }
   0xf   : > { %s3122_s30 = sadd.s32 1, %s3042_s27   ;;  %s40_s8 = sadd.s32 1, %s3038_s26 }
  0x10   : > { %4273 = sst [smem:[#allocation20_spill]] %s3122_s30  ;;  %s37_s9 = ssub.s32 %s3042_s27, %s3122_s30 }
  0x11   : > { %p47_p0 = scmp.ne.s32.totalorder %s3038_s26, %s3034_s25  ;;  %p38_p1 = scmp.eq.s32.totalorder %s37_s9, 0 }
  0x12   : > { %p48_p2 = scmp.eq.s32.totalorder %s3042_s27, 0  ;;  %p53_p3 = scmp.ne.s32.totalorder %s3034_s25, %s3030_s24 }
  0x13   : > { %p4261_p4 = scmp.eq.s32.totalorder %s3118_s28, 0  ;;  %p197_p7 = scmp.eq.s32.totalorder %s3118_s28, 1 }
  0x14   : > { %s3134_s10 = scalar_select %p38_p1, %s3038_s26, %s40_s8  }
  0x15   : > { %p3136_p5 = por %p48_p2, %p47_p0  ;;  %p3142_p6 = por %p4261_p4, %p53_p3 }
  0x16   : > { %4274 = sst [smem:[#allocation21_spill]] %s3134_s10  ;;  %p203_p8 = scmp.eq.s32.totalorder %s2164_s29, 1 }
  0x17   : > { %s4275_s11 = scalar_select %p3136_p5, 1, 0 }
  0x18   : > { %s4276_s12 = scalar_select %p3142_p6, 1, 0 }
  0x19   : > { %p2165_p9 = scmp.ge.s32.totalorder %s3042_s27, 1  ;;  %p236_p10 = scmp.lt.s32.totalorder %s3042_s27, 3 }
  0x1a   : > { %p3149_p11 = por %p197_p7, %p47_p0  ;;  %p3153_p12 = por %p203_p8, %p53_p3 }
  0x1b   : > { %p3157_p13 = pnand %p2165_p9, %p236_p10  ;;  %s3044_s16 = smov [#allocation10]  }
  0x1c   : > { %s4277_s13 = scalar_select %p3149_p11, 1, 0 }
  0x1d   : > { %s4278_s14 = scalar_select %p3153_p12, 1, 0 }
  0x1e   : > { %s4280_s15 = scalar_select %p3157_p13, 1, 0 }
  0x1f   : > { %4279 = sst [smem:[#allocation22_spill]] %s4278_s14  ;;  %p2377_p1 = pneg %p3157_p13 }
  0x20   : > { %s248_s17 = sshll.u32 %s3044_s16, 4  ;;  %s4260_s19 = sand.u32 1, %s3038_s26   ;;  %s249_s17 = int_to_ptr.vmem [resolvable:$true] %s248_s17 }
  0x21   : > { %p3165_p2 = pnand %p2377_p1, %p4261_p4  ;;  %s3174_s20 = smul.u32 152, %s4260_s19 }
  0x22   : > { %s4282_s4 = sld [smem:[#allocation58_spill]] }
  0x23   : > { %p2786_p8 = pneg %p3165_p2 }
  0x28   : > { %s2784_s23 = scalar_lea.hbm %s4282_s4, 10240 }
  0x29   : > { %p2785_p7 = scmp.ne.s32.totalorder %s4282_s4, %s2784_s23  ;;  %p2791_p1 = scmp.lt.u32.totalorder %s2784_s23, %s4282_s4 }
  0x2b   : > { %p2787_p9 = pnand %p2786_p8, %p2785_p7 }
  0x2d   : > { %p2788_p10 = pneg %p2787_p9 }
  0x2f   : > { %p2793_p0 = pnand %p2791_p1, %p2788_p10 }
  0x31   : > { %2796 = shalt.err (!%p2793_p0)
}
  0x32   : > { %s2797_s19 = scalar_lea.vmem %s249_s17, 10240  ;;  %p2805_p11 = scmp.lt.s32.totalorder %s249_s17, %s249_s17 }
  0x33   : > { %p2798_p4 = scmp.ne.s32.totalorder %s249_s17, %s2797_s19  ;;  %p2806_p6 = scmp.lt.s32.totalorder %s2797_s19, %s2797_s19 }
  0x35   : > { %p2800_p3 = pnand %p2798_p4, %p2786_p8  ;;  %p2807_p13 = por %p2806_p6, %p2805_p11 }
  0x37   : > { %p2801_p12 = pneg %p2800_p3 }
  0x39   : > { %p2808_p5 = pnand %p2807_p13, %p2801_p12 }
  0x3b   : > { %2811 = shalt.err (!%p2808_p5)
}
  0x3c   : > { %s3045_s21 = smov 320   ;;  %s3046_s22 = smov 20  }
  0x3d   : > { %2380 = dma.hbm_to_vmem [thread:$0]  (!%p3165_p2), %s4282_s4, 10240, %s249_s17, [#allocation9], %s3045_s21, %s3045_s21, %s3046_s22  }
  0x3e   : > { %s3193_s8 = smul.u32 2432, %s3042_s27  ;;  %p4283_p4 = scmp.ne.s32.totalorder %s4275_s11, 0 }
  0x3f   : > { %p4284_p6 = scmp.lt.s32.totalorder %s3042_s27, 2  ;;  %s4267_s9 = sand.u32 1, %s3042_s27  }
  0x40   : > { %s4286_s1 = sld [smem:[#allocation57_spill]]  ;;  %s290_s17 = scalar_lea.vmem [#allocation5], %s3174_s20 }
  0x41   : > { %p3199_p5 = pnand %p4284_p6, %p4283_p4  ;;  %s297_s18 = sshll.u32 %s290_s17, 4  ;;  %s3211_s18 = int_to_ptr.vmem [resolvable:$true] %s297_s18 }
  0x42   : > { %s3215_s11 = scalar_lea.sflag [#allocation6], %s4267_s9 }
  0x43   : > { %p3221_p12 = pneg %p3199_p5 }
  0x46   : > { %s3208_s30 = scalar_lea.hbm %s4286_s1, %s3193_s8  ;;  %s2817_s29 = scalar_lea.hbm %s4286_s1, 4864 }
  0x47   : > { %s2812_s21 = scalar_lea.hbm %s3208_s30, 2432  ;;  %p2818_p0 = scmp.lt.u32.totalorder %s3208_s30, %s4286_s1 }
  0x48   : > { %p2813_p11 = scmp.ne.s32.totalorder %s3208_s30, %s2812_s21  ;;  %p2819_p3 = scmp.lt.u32.totalorder %s2817_s29, %s2812_s21 }
  0x49   : > { %p2821_p8 = scmp.lt.u32.totalorder %s2812_s21, %s3208_s30 }
  0x4a   : > { %p2815_p13 = pnand %p3221_p12, %p2813_p11  ;;  %p2820_p7 = por %p2819_p3, %p2818_p0 }
  0x4c   : > { %p2816_p2 = pneg %p2815_p13  ;;  %p2822_p9 = por %p2821_p8, %p2820_p7 }
  0x4e   : > { %p2823_p10 = pnand %p2822_p9, %p2816_p2 }
  0x50   : > { %2826 = shalt.err (!%p2823_p10)
}
  0x51   : > { %s2827_s9 = scalar_lea.vmem %s3211_s18, 2432  ;;  %s3047_s10 = smov [#allocation5]  }
  0x52   : > { %p2828_p1 = scmp.ne.s32.totalorder %s3211_s18, %s2827_s9  ;;  %s2832_s23 = sshll.u32 %s3047_s10, 4  ;;  %s2833_s23 = int_to_ptr.vmem [resolvable:$false] %s2832_s23 }
  0x53   : > { %s2834_s16 = scalar_lea.vmem %s2833_s23, 4864  ;;  %p2835_p11 = scmp.lt.s32.totalorder %s3211_s18, %s2833_s23 }
  0x54   : > { %p2830_p4 = pnand %p2828_p1, %p3221_p12  ;;  %p2836_p13 = scmp.lt.s32.totalorder %s2834_s16, %s2827_s9 }
  0x56   : > { %p2831_p6 = pneg %p2830_p4  ;;  %p2837_p0 = por %p2836_p13, %p2835_p11 }
  0x58   : > { %p2838_p3 = pnand %p2837_p0, %p2831_p6 }
  0x5a   : > { %2841 = shalt.err (!%p2838_p3)
}
  0x5b   : > { %s4269_s21 = smov 128   ;;  %s3049_s29 = smov 8  }
  0x5c   : > { %2387 = dma.hbm_to_vmem [thread:$0]  (!%p3199_p5), %s3208_s30, 2432, %s3211_s18, %s3215_s11, %s4269_s21, %s4269_s21, %s3049_s29  }
  0x5d   : > { %s3252_s10 = scalar_lea.hbm %s4252_s0, %s3193_s8  ;;  %s269_s23 = scalar_lea.vmem [#allocation2], %s3174_s20 }
  0x5e   : > { %s276_s16 = sshll.u32 %s269_s23, 4  ;;  %s4288_s1 = sand.u32 1, %s3038_s26   ;;  %s3255_s16 = int_to_ptr.vmem [resolvable:$true] %s276_s16 }
  0x5f   : > { %s3259_s4 = scalar_lea.sflag [#allocation3], %s4288_s1  ;;  %s2842_s14 = scalar_lea.hbm %s3252_s10, 2432 }
  0x60   : > { %p2843_p2 = scmp.ne.s32.totalorder %s3252_s10, %s2842_s14  ;;  %s2847_s17 = scalar_lea.hbm %s4252_s0, 4864 }
  0x61   : > { %p2848_p9 = scmp.lt.u32.totalorder %s3252_s10, %s4252_s0  ;;  %p2849_p10 = scmp.lt.u32.totalorder %s2847_s17, %s2842_s14 }
  0x62   : > { %p2845_p7 = pnand %p2843_p2, %p3221_p12  ;;  %p2851_p4 = scmp.lt.u32.totalorder %s2842_s14, %s3252_s10 }
  0x63   : > { %p2850_p1 = por %p2849_p10, %p2848_p9 }
  0x64   : > { %p2846_p8 = pneg %p2845_p7 }
  0x65   : > { %p2852_p6 = por %p2851_p4, %p2850_p1 }
  0x67   : > { %p2853_p11 = pnand %p2852_p6, %p2846_p8 }
  0x69   : > { %2856 = shalt.err (!%p2853_p11)
}
  0x6a   : > { %s2857_s1 = scalar_lea.vmem %s3255_s16, 2432  ;;  %s3050_s23 = smov [#allocation2]  }
  0x6b   : > { %p2858_p13 = scmp.ne.s32.totalorder %s3255_s16, %s2857_s1  ;;  %s2862_s30 = sshll.u32 %s3050_s23, 4  ;;  %s2863_s30 = int_to_ptr.vmem [resolvable:$false] %s2862_s30 }
  0x6c   : > { %s2864_s21 = scalar_lea.vmem %s2863_s30, 4864  ;;  %p2865_p2 = scmp.lt.s32.totalorder %s3255_s16, %s2863_s30 }
  0x6d   : > { %p2860_p0 = pnand %p2858_p13, %p3221_p12  ;;  %p2866_p7 = scmp.lt.s32.totalorder %s2864_s21, %s2857_s1 }
  0x6f   : > { %p2861_p3 = pneg %p2860_p0  ;;  %p2867_p9 = por %p2866_p7, %p2865_p2 }
  0x71   : > { %p2868_p10 = pnand %p2867_p9, %p2861_p3 }
  0x73   : > { %2871 = shalt.err (!%p2868_p10)
}
  0x74   : > { %s4289_s14 = smov 128   ;;  %s3290_s9 = scalar_lea.hbm %s4254_s2, %s3193_s8 }
  0x75   : > { %2384 = dma.hbm_to_vmem [thread:$0]  (!%p3199_p5), %s3252_s10, 2432, %s3255_s16, %s3259_s4, %s4289_s14, %s4289_s14, %s3049_s29  }
  0x76   : > { %s311_s1 = scalar_lea.vmem [#allocation7], %s3174_s20  ;;  %s2872_s30 = scalar_lea.hbm %s3290_s9, 2432 }
  0x77   : > { %s318_s23 = sshll.u32 %s311_s1, 4  ;;  %p2873_p8 = scmp.ne.s32.totalorder %s3290_s9, %s2872_s30  ;;  %s3293_s23 = int_to_ptr.vmem [resolvable:$true] %s318_s23 }
  0x78   : > { %s2877_s10 = scalar_lea.hbm %s4254_s2, 4864  ;;  %p2878_p6 = scmp.lt.u32.totalorder %s3290_s9, %s4254_s2 }
  0x79   : > { %p2875_p1 = pnand %p2873_p8, %p3221_p12  ;;  %p2879_p11 = scmp.lt.u32.totalorder %s2877_s10, %s2872_s30 }
  0x7a   : > { %p2881_p0 = scmp.lt.u32.totalorder %s2872_s30, %s3290_s9 }
  0x7b   : > { %p2876_p4 = pneg %p2875_p1  ;;  %p2880_p13 = por %p2879_p11, %p2878_p6 }
  0x7d   : > { %p2882_p3 = por %p2881_p0, %p2880_p13 }
  0x7f   : > { %p2883_p2 = pnand %p2882_p3, %p2876_p4 }
  0x81   : > { %2886 = shalt.err (!%p2883_p2)
}
  0x82   : > { %s2887_s17 = scalar_lea.vmem %s3293_s23, 2432  ;;  %s3051_s1 = smov [#allocation7]  }
  0x83   : > { %p2888_p7 = scmp.ne.s32.totalorder %s3293_s23, %s2887_s17  ;;  %s2892_s21 = sshll.u32 %s3051_s1, 4  ;;  %s2893_s21 = int_to_ptr.vmem [resolvable:$false] %s2892_s21 }
  0x84   : > { %s2894_s4 = scalar_lea.vmem %s2893_s21, 4864  ;;  %p2895_p8 = scmp.lt.s32.totalorder %s3293_s23, %s2893_s21 }
  0x85   : > { %p2890_p9 = pnand %p2888_p7, %p3221_p12  ;;  %p2896_p1 = scmp.lt.s32.totalorder %s2894_s4, %s2887_s17 }
  0x87   : > { %p2891_p10 = pneg %p2890_p9  ;;  %p2897_p6 = por %p2896_p1, %p2895_p8 }
  0x89   : > { %p2898_p11 = pnand %p2897_p6, %p2891_p10 }
  0x8b   : > { %2901 = shalt.err (!%p2898_p11)
}
  0x8c   : > { %2390 = dma.hbm_to_vmem [thread:$0]  (!%p3199_p5), %s3290_s9, 2432, %s3293_s23, %s3215_s11, %s4289_s14, %s4289_s14, %s3049_s29  }
  0x8d   : > { %s3324_s16 = scalar_lea.hbm %s4255_s3, %s3193_s8  ;;  %s332_s18 = scalar_lea.vmem [#allocation8], %s3174_s20 }
  0x8e   : > { %s339_s17 = sshll.u32 %s332_s18, 4  ;;  %s4290_s1 = sand.u32 1, %s3042_s27   ;;  %s3327_s17 = int_to_ptr.vmem [resolvable:$true] %s339_s17 }
  0x8f   : > { %s3331_s21 = scalar_lea.sflag [#allocation9], %s4290_s1  ;;  %s2902_s4 = scalar_lea.hbm %s3324_s16, 2432 }
  0x90   : > { %p2903_p4 = scmp.ne.s32.totalorder %s3324_s16, %s2902_s4  ;;  %s2907_s8 = scalar_lea.hbm %s4255_s3, 4864 }
  0x91   : > { %p2908_p3 = scmp.lt.u32.totalorder %s3324_s16, %s4255_s3  ;;  %p2909_p2 = scmp.lt.u32.totalorder %s2907_s8, %s2902_s4 }
  0x92   : > { %p2905_p13 = pnand %p2903_p4, %p3221_p12  ;;  %p2911_p9 = scmp.lt.u32.totalorder %s2902_s4, %s3324_s16 }
  0x93   : > { %p2910_p7 = por %p2909_p2, %p2908_p3 }
  0x94   : > { %p2906_p0 = pneg %p2905_p13 }
  0x95   : > { %p2912_p10 = por %p2911_p9, %p2910_p7 }
  0x97   : > { %p2913_p8 = pnand %p2912_p10, %p2906_p0 }
  0x99   : > { %2916 = shalt.err (!%p2913_p8)
}
  0x9a   : > { %s2917_s20 = scalar_lea.vmem %s3327_s17, 2432  ;;  %s3052_s10 = smov [#allocation8]  }
  0x9b   : > { %p2918_p1 = scmp.ne.s32.totalorder %s3327_s17, %s2917_s20  ;;  %s2922_s18 = sshll.u32 %s3052_s10, 4  ;;  %s2923_s18 = int_to_ptr.vmem [resolvable:$false] %s2922_s18 }
  0x9c   : > { %s2924_s1 = scalar_lea.vmem %s2923_s18, 4864  ;;  %p2925_p4 = scmp.lt.s32.totalorder %s3327_s17, %s2923_s18 }
  0x9d   : > { %p2920_p6 = pnand %p2918_p1, %p3221_p12  ;;  %p2926_p13 = scmp.lt.s32.totalorder %s2924_s1, %s2917_s20 }
  0x9f   : > { %p2921_p11 = pneg %p2920_p6  ;;  %p2927_p3 = por %p2926_p13, %p2925_p4 }
  0xa1   : > { %p2928_p2 = pnand %p2927_p3, %p2921_p11 }
  0xa3   : > { %2931 = shalt.err (!%p2928_p2)
}
  0xa4   : > { %2393 = dma.hbm_to_vmem [thread:$0]  (!%p3199_p5), %s3324_s16, 2432, %s3327_s17, %s3331_s21, %s4289_s14, %s4289_s14, %s3049_s29  }
  0xa5   : > { %p4291_p12 = scmp.ne.s32.totalorder %s4280_s15, 0 }
  0xa7   : > { %351 = sbr.rel (%p4291_p12) target bundleno = 663 (0x297), region = 44 }
  0xae   : > { %s3361_s22 = sand.u32 1, %s3034_s25   ;;  %p4292_p0 = scmp.ne.s32.totalorder %s4276_s12, 0 }
  0xaf   : > { %s3364_s4 = smul.u32 152, %s3361_s22  ;;  %s354_s19 = scalar_lea.sflag [#allocation3], %s3361_s22 }
  0xb1   : > { %s3368_s11 = scalar_lea.vmem [#allocation2], %s3364_s4 }
  0xb2   : > { %3005 = dma.done.wait (%p4292_p0), %s354_s19, 2432  }
  0xb3   : > { %3007 = vsyncadd (%p4292_p0), %s354_s19, 4294964864  ;;  %s362_s15 = sand.u32 1, %s3118_s28   ;;  %s3376_s14 = scalar_lea.vmem [#allocation5], %s3364_s4 }
  0xb4   : > { %s363_s29 = scalar_lea.sflag [#allocation6], %s362_s15 }
  0xb5   : > { %3009 = dma.done.wait (%p4292_p0), %s363_s29, 4864  }
  0xb6   : > { %3011 = vsyncadd (%p4292_p0), %s363_s29, 4294962432  ;;  %s3383_s16 = scalar_lea.vmem [#allocation7], %s3364_s4  ;;  %s381_s17 = scalar_lea.sflag [#allocation9], %s362_s15 }
  0xb7   : > { %s3386_s21 = scalar_lea.vmem [#allocation8], %s3364_s4 }
  0xb8   : > { %3013 = dma.done.wait (%p4292_p0), %s381_s17, 2432  }
  0xb9   : > { %3015 = vsyncadd (%p4292_p0), %s381_s17, 4294964864  ;;  %p4293_p5 = scmp.eq.s32.totalorder %s3118_s28, 0 }
  0xbb   : > { %3017 = dma.done.wait (%p4293_p5), [#allocation9], 10240   ;;  %p4294_p7 = pmov %p4293_p5 }
  0xbc   : > { %v2444_v0 = vld [vmem:[#allocation10 + $0x4] ss:$20 sps:$4 sm:$0xff]   ;;  %v2446_v1 = vld [vmem:[#allocation10 + $0xc] ss:$20 sps:$4 sm:$0xff]   ;;  %v2449_v3 = vld [vmem:[#allocation10 + $0x8] ss:$20 sps:$4 sm:$0xff]  }
  0xbd   : > { %3019 = vsyncadd (%p4294_p7), [#allocation9], 4294957056  ;;  %1043 = vmatprep.subr.bf16.mxu0 %v2444_v0  ;;  %v2448_v2 = vld [vmem:[#allocation10] ss:$20 sps:$4 sm:$0xff]   ;;  %1174 = vmatprep.subr.bf16.mxu1 %v2446_v1  ;;  %v2454_v6 = vld [vmem:[#allocation10 + $0x28] ss:$20 sps:$4 sm:$0xff]  }
  0xbe   : > { %v2450_v4 = vld [vmem:[#allocation10 + $0x2c] ss:$20 sps:$4 sm:$0xff]   ;;  %1044 = vmatpush1.bf16.msra.mxu0 %v2448_v2  ;;  %1175 = vmatpush1.bf16.msra.mxu1 %v2449_v3  ;;  %v2452_v5 = vld [vmem:[#allocation10 + $0x34] ss:$20 sps:$4 sm:$0xff]   ;;  %v2455_v7 = vld [vmem:[#allocation10 + $0x30] ss:$20 sps:$4 sm:$0xff]  }
  0xbf   : > { %1045 = vmatprep.subr.bf16.mxu0 %v2450_v4  ;;  %1176 = vmatprep.subr.bf16.mxu1 %v2452_v5  ;;  %v2456_v8 = vld [vmem:[#allocation10 + $0x54] ss:$20 sps:$4 sm:$0xff]   ;;  %v2458_v9 = vld [vmem:[#allocation10 + $0x5c] ss:$20 sps:$4 sm:$0xff]   ;;  %v2461_v11 = vld [vmem:[#allocation10 + $0x58] ss:$20 sps:$4 sm:$0xff]  }
  0xc0   : > { %v2460_v10 = vld [vmem:[#allocation10 + $0x50] ss:$20 sps:$4 sm:$0xff]   ;;  %v2466_v14 = vld [vmem:[#allocation10 + $0x78] ss:$20 sps:$4 sm:$0xff]   ;;  %v2467_v15 = vld [vmem:[#allocation10 + $0x80] ss:$20 sps:$4 sm:$0xff]  }
  0xc1   : > { %v2462_v12 = vld [vmem:[#allocation10 + $0x7c] ss:$20 sps:$4 sm:$0xff]   ;;  %v2464_v13 = vld [vmem:[#allocation10 + $0x84] ss:$20 sps:$4 sm:$0xff]   ;;  %v2470_v17 = vld [vmem:[#allocation10 + $0xac] ss:$20 sps:$4 sm:$0xff]  }
  0xc2   : > { %1046 = vmatpush1.bf16.msra.mxu0 %v2454_v6  ;;  %1177 = vmatpush1.bf16.msra.mxu1 %v2455_v7  ;;  %v2468_v16 = vld [vmem:[#allocation10 + $0xa4] ss:$20 sps:$4 sm:$0xff]   ;;  %v2472_v18 = vld [vmem:[#allocation10 + $0xa0] ss:$20 sps:$4 sm:$0xff]   ;;  %v2473_v19 = vld [vmem:[#allocation10 + $0xa8] ss:$20 sps:$4 sm:$0xff]  }
  0xc3   : > { %1047 = vmatprep.subr.bf16.mxu0 %v2456_v8  ;;  %1178 = vmatprep.subr.bf16.mxu1 %v2458_v9  ;;  %v2474_v20 = vld [vmem:[#allocation10 + $0xcc] ss:$20 sps:$4 sm:$0xff]   ;;  %v2476_v21 = vld [vmem:[#allocation10 + $0xd4] ss:$20 sps:$4 sm:$0xff]   ;;  %v2479_v23 = vld [vmem:[#allocation10 + $0xd0] ss:$20 sps:$4 sm:$0xff]  }
  0xc4   : > { %v2478_v22 = vld [vmem:[#allocation10 + $0xc8] ss:$20 sps:$4 sm:$0xff]   ;;  %v2484_v26 = vld [vmem:[#allocation10 + $0xf0] ss:$20 sps:$4 sm:$0xff]   ;;  %v2485_v27 = vld [vmem:[#allocation10 + $0xf8] ss:$20 sps:$4 sm:$0xff]  }
  0xc5   : > { %v2480_v24 = vld [vmem:[#allocation10 + $0xf4] ss:$20 sps:$4 sm:$0xff]   ;;  %v2482_v25 = vld [vmem:[#allocation10 + $0xfc] ss:$20 sps:$4 sm:$0xff]   ;;  %v2488_v29 = vld [vmem:[#allocation10 + $0x124] ss:$20 sps:$4 sm:$0xff]  }
  0xc6   : > { %1048 = vmatpush1.bf16.msra.mxu0 %v2460_v10  ;;  %1179 = vmatpush1.bf16.msra.mxu1 %v2461_v11  ;;  %v2486_v28 = vld [vmem:[#allocation10 + $0x11c] ss:$20 sps:$4 sm:$0xff]   ;;  %v2490_v30 = vld [vmem:[#allocation10 + $0x118] ss:$20 sps:$4 sm:$0xff]   ;;  %v2491_v31 = vld [vmem:[#allocation10 + $0x120] ss:$20 sps:$4 sm:$0xff]  }
  0xc7   : > { %1049 = vmatprep.subr.bf16.mxu0 %v2462_v12  ;;  %1180 = vmatprep.subr.bf16.mxu1 %v2464_v13  ;;  %v2492_v32 = vld [vmem:[#allocation10 + $0x144] ss:$20 sps:$4 sm:$0xff]   ;;  %v2494_v33 = vld [vmem:[#allocation10 + $0x14c] ss:$20 sps:$4 sm:$0xff]   ;;  %v2497_v35 = vld [vmem:[#allocation10 + $0x148] ss:$20 sps:$4 sm:$0xff]  }
  0xc8   : > { %v2496_v34 = vld [vmem:[#allocation10 + $0x140] ss:$20 sps:$4 sm:$0xff]   ;;  %v2502_v38 = vld [vmem:[#allocation10 + $0x168] ss:$20 sps:$4 sm:$0xff]   ;;  %v2503_v39 = vld [vmem:[#allocation10 + $0x170] ss:$20 sps:$4 sm:$0xff]  }
  0xc9   : > { %v2498_v36 = vld [vmem:[#allocation10 + $0x16c] ss:$20 sps:$4 sm:$0xff]   ;;  %v2500_v37 = vld [vmem:[#allocation10 + $0x174] ss:$20 sps:$4 sm:$0xff]   ;;  %v2506_v41 = vld [vmem:[#allocation10 + $0x19c] ss:$20 sps:$4 sm:$0xff]  }
  0xca   : > { %1050 = vmatpush1.bf16.msra.mxu0 %v2466_v14  ;;  %1181 = vmatpush1.bf16.msra.mxu1 %v2467_v15  ;;  %v2504_v40 = vld [vmem:[#allocation10 + $0x194] ss:$20 sps:$4 sm:$0xff]   ;;  %v2508_v42 = vld [vmem:[#allocation10 + $0x190] ss:$20 sps:$4 sm:$0xff]   ;;  %v2509_v43 = vld [vmem:[#allocation10 + $0x198] ss:$20 sps:$4 sm:$0xff]  }
  0xcb   : > { %1051 = vmatprep.subr.bf16.mxu0 %v2468_v16  ;;  %1182 = vmatprep.subr.bf16.mxu1 %v2470_v17  ;;  %v2510_v44 = vld [vmem:[#allocation10 + $0x1bc] ss:$20 sps:$4 sm:$0xff]   ;;  %v2512_v45 = vld [vmem:[#allocation10 + $0x1c4] ss:$20 sps:$4 sm:$0xff]   ;;  %v2515_v48 = vld [vmem:[#allocation10 + $0x1c0] ss:$20 sps:$4 sm:$0xff]  }
  0xcc   : > { %v475_v46 = vld [vmem:[%s3383_s16] sm:$0xff]  ;;  %v476_v49 = vld [vmem:[%s3383_s16 + $0x8] sm:$0xff]  ;;  %v477_v6 = vld [vmem:[%s3383_s16 + $0x10] sm:$0xff]  ;;  %s4037_s8 = scalar_lea.vmem [#allocation12], %s3364_s4  ;;  %s4098_s23 = scalar_lea.vmem [#allocation11], %s3364_s4 }
  0xcd   : > { %v2514_v47 = vld [vmem:[#allocation10 + $0x1b8] ss:$20 sps:$4 sm:$0xff]   ;;  %v3398_v51 = vpack.c.bf16 %v476_v49, %v475_v46  ;;  %v2520_v53 = vld [vmem:[#allocation10 + $0x1e0] ss:$20 sps:$4 sm:$0xff]   ;;  %v2521_v54 = vld [vmem:[#allocation10 + $0x1e8] ss:$20 sps:$4 sm:$0xff]  }
  0xce   : > { %1052 = vmatpush1.bf16.msra.mxu0 %v2472_v18  ;;  %1183 = vmatpush1.bf16.msra.mxu1 %v2473_v19  ;;  %v2516_v50 = vld [vmem:[#allocation10 + $0x1e4] ss:$20 sps:$4 sm:$0xff]   ;;  %v2518_v52 = vld [vmem:[#allocation10 + $0x1ec] ss:$20 sps:$4 sm:$0xff]   ;;  %v2524_v56 = vld [vmem:[#allocation10 + $0x214] ss:$20 sps:$4 sm:$0xff]  }
  0xcf   : > { %1053 = vmatprep.subr.bf16.mxu0 %v2474_v20  ;;  %1184 = vmatprep.subr.bf16.mxu1 %v2476_v21  ;;  %v2522_v55 = vld [vmem:[#allocation10 + $0x20c] ss:$20 sps:$4 sm:$0xff]   ;;  %v2526_v57 = vld [vmem:[#allocation10 + $0x208] ss:$20 sps:$4 sm:$0xff]   ;;  %v2527_v58 = vld [vmem:[#allocation10 + $0x210] ss:$20 sps:$4 sm:$0xff]  }
  0xd0   : > { %1075 = vmatprep.mubr.bf16.mxu0 %v3398_v51  ;;  %1206 = vmatprep.mubr.bf16.mxu1 %v3398_v51  ;;  %v2528_v59 = vld [vmem:[#allocation10 + $0x234] ss:$20 sps:$4 sm:$0xff]   ;;  %v2530_v60 = vld [vmem:[#allocation10 + $0x23c] ss:$20 sps:$4 sm:$0xff]   ;;  %v2533_v62 = vld [vmem:[#allocation10 + $0x238] ss:$20 sps:$4 sm:$0xff]  }
  0xd1   : > { %v2532_v61 = vld [vmem:[#allocation10 + $0x230] ss:$20 sps:$4 sm:$0xff]   ;;  %v2538_v1 = vld [vmem:[#allocation10 + $0x258] ss:$20 sps:$4 sm:$0xff]   ;;  %v2539_v2 = vld [vmem:[#allocation10 + $0x260] ss:$20 sps:$4 sm:$0xff]  }
  0xd2   : > { %1054 = vmatpush1.bf16.msra.mxu0 %v2478_v22  ;;  %1185 = vmatpush1.bf16.msra.mxu1 %v2479_v23  ;;  %v2534_v63 = vld [vmem:[#allocation10 + $0x25c] ss:$20 sps:$4 sm:$0xff]   ;;  %v2536_v0 = vld [vmem:[#allocation10 + $0x264] ss:$20 sps:$4 sm:$0xff]   ;;  %v2544_v17 = vld [vmem:[#allocation10 + $0x1a0] ss:$20 sps:$4 sm:$0xff]  }
  0xd3   : > { %1055 = vmatprep.subr.bf16.mxu0 %v2480_v24  ;;  %1186 = vmatprep.subr.bf16.mxu1 %v2482_v25  ;;  %v446_v3 = vld [vmem:[%s3368_s11] sm:$0xff]  ;;  %v447_v4 = vld [vmem:[%s3368_s11 + $0x8] sm:$0xff]  ;;  %v478_v7 = vld [vmem:[%s3383_s16 + $0x18] sm:$0xff]  ;;  %s2262_s30 = smul.u32 2432, %s3118_s28  ;;  %s1984_s20 = sshll.u32 %s4037_s8, 4  ;;  %s4156_s20 = int_to_ptr.vmem [resolvable:$true] %s1984_s20 }
  0xd4   : > { %v2540_v5 = vld [vmem:[#allocation10 + $0x150] ss:$20 sps:$4 sm:$0xff]   ;;  %v3406_v8 = vpack.c.bf16 %v447_v4, %v446_v3  ;;  %v3408_v10 = vpack.c.bf16 %v478_v7, %v477_v6  ;;  %v2542_v11 = vld [vmem:[#allocation10 + $0x178] ss:$20 sps:$4 sm:$0xff]   ;;  %v2545_v20 = vld [vmem:[#allocation10 + $0x60] ss:$20 sps:$4 sm:$0xff]  }
  0xd5   : > { %v2541_v9 = vld [vmem:[#allocation10 + $0x10] ss:$20 sps:$4 sm:$0xff]   ;;  %v2543_v14 = vld [vmem:[#allocation10 + $0x38] ss:$20 sps:$4 sm:$0xff]   ;;  %v2546_v21 = vld [vmem:[#allocation10 + $0x1c8] ss:$20 sps:$4 sm:$0xff]   ;;  %s4154_s1 = scalar_lea.hbm %s4259_s7, %s2262_s30 }
  0xd6   : > { %1056 = vmatpush1.bf16.msra.mxu0 %v2484_v26  ;;  %1187 = vmatpush1.bf16.msra.mxu1 %v2485_v27  ;;  %v448_v12 = vld [vmem:[%s3368_s11 + $0x10] sm:$0xff]  ;;  %v449_v13 = vld [vmem:[%s3368_s11 + $0x18] sm:$0xff]  ;;  %v479_v15 = vld [vmem:[%s3383_s16 + $0x20] sm:$0xff]  ;;  %s1955_s4 = scalar_lea.sflag [#allocation13], %s3361_s22  ;;  %s2932_s19 = scalar_lea.vmem %s4156_s20, 2432 }
  0xd7   : > { %1057 = vmatprep.subr.bf16.mxu0 %v2486_v28  ;;  %1188 = vmatprep.subr.bf16.mxu1 %v2488_v29  ;;  %v480_v16 = vld [vmem:[%s3383_s16 + $0x28] sm:$0xff]  ;;  %v3418_v18 = vpack.c.bf16 %v449_v13, %v448_v12  ;;  %v450_v22 = vld [vmem:[%s3368_s11 + $0x20] sm:$0xff]  ;;  %v481_v24 = vld [vmem:[%s3383_s16 + $0x30] sm:$0xff]  ;;  %p2933_p9 = scmp.ne.s32.totalorder %s4156_s20, %s2932_s19  ;;  %p4362_p10 = scmp.ne.s32.totalorder %s4277_s13, 0 }
  0xd8   : > { %v3420_v19 = vpack.c.bf16 %v480_v16, %v479_v15  ;;  %v451_v23 = vld [vmem:[%s3368_s11 + $0x28] sm:$0xff]  ;;  %v482_v25 = vld [vmem:[%s3383_s16 + $0x38] sm:$0xff]  ;;  %v456_v49 = vld [vmem:[%s3368_s11 + $0x50] sm:$0xff] }
  0xd9   : > { %v2547_v26 = vld [vmem:[#allocation10 + $0x88] ss:$20 sps:$4 sm:$0xff]   ;;  %v2548_v27 = vld [vmem:[#allocation10 + $0x1f0] ss:$20 sps:$4 sm:$0xff]   ;;  %v3430_v28 = vpack.c.bf16 %v451_v23, %v450_v22  ;;  %v3432_v29 = vpack.c.bf16 %v482_v25, %v481_v24  ;;  %p2934_p8 = pnand %p2933_p9, %p4362_p10 }
  0xda   : > { %1058 = vmatpush1.bf16.msra.mxu0 %v2490_v30  ;;  %1189 = vmatpush1.bf16.msra.mxu1 %v2491_v31  ;;  %v2549_v30 = vld [vmem:[#allocation10 + $0xb0] ss:$20 sps:$4 sm:$0xff]   ;;  %v2550_v31 = vld [vmem:[#allocation10 + $0x218] ss:$20 sps:$4 sm:$0xff]   ;;  %v2555_v46 = vld [vmem:[#allocation10 + $0x128] ss:$20 sps:$4 sm:$0xff]  }
  0xdb   : > { %1059 = vmatprep.subr.bf16.mxu0 %v2492_v32  ;;  %1190 = vmatprep.subr.bf16.mxu1 %v2494_v33  ;;  %v452_v32 = vld [vmem:[%s3368_s11 + $0x30] sm:$0xff]  ;;  %v453_v33 = vld [vmem:[%s3368_s11 + $0x38] sm:$0xff]  ;;  %v462_v4 = vld [vmem:[%s3368_s11 + $0x80] sm:$0xff]  ;;  %p2935_p1 = pneg %p2934_p8 }
  0xdc   : > { %v493_v6 = vld [vmem:[%s3383_s16 + $0x90] sm:$0xff]  ;;  %v3490_v13 = vld [vmem:[%s4257_s5] sm:$0x1f] }
  0xde   : > { %1060 = vmatpush1.bf16.msra.mxu0 %v2496_v34  ;;  %1191 = vmatpush1.bf16.msra.mxu1 %v2497_v35  ;;  %v483_v34 = vld [vmem:[%s3383_s16 + $0x40] sm:$0xff]  ;;  %v484_v35 = vld [vmem:[%s3383_s16 + $0x48] sm:$0xff] }
  0xdf   : > { %1061 = vmatprep.subr.bf16.mxu0 %v2498_v36  ;;  %1192 = vmatprep.subr.bf16.mxu1 %v2500_v37  ;;  %v2551_v36 = vld [vmem:[#allocation10 + $0xd8] ss:$20 sps:$4 sm:$0xff]   ;;  %v2552_v37 = vld [vmem:[#allocation10 + $0x240] ss:$20 sps:$4 sm:$0xff]  }
  0xe2   : > { %1062 = vmatpush1.bf16.msra.mxu0 %v2502_v38  ;;  %1193 = vmatpush1.bf16.msra.mxu1 %v2503_v39  ;;  %v3442_v38 = vpack.c.bf16 %v453_v33, %v452_v32  ;;  %v3444_v39 = vpack.c.bf16 %v484_v35, %v483_v34 }
  0xe3   : > { %1063 = vmatprep.subr.bf16.mxu0 %v2504_v40  ;;  %1194 = vmatprep.subr.bf16.mxu1 %v2506_v41  ;;  %v2553_v40 = vld [vmem:[#allocation10 + $0x100] ss:$20 sps:$4 sm:$0xff]   ;;  %v2554_v41 = vld [vmem:[#allocation10 + $0x268] ss:$20 sps:$4 sm:$0xff]  }
  0xe6   : > { %1064 = vmatpush1.bf16.msra.mxu0 %v2508_v42  ;;  %1195 = vmatpush1.bf16.msra.mxu1 %v2509_v43  ;;  %v454_v42 = vld [vmem:[%s3368_s11 + $0x40] sm:$0xff]  ;;  %v455_v43 = vld [vmem:[%s3368_s11 + $0x48] sm:$0xff] }
  0xe7   : > { %1065 = vmatprep.subr.bf16.mxu0 %v2510_v44  ;;  %1196 = vmatprep.subr.bf16.mxu1 %v2512_v45  ;;  %v485_v44 = vld [vmem:[%s3383_s16 + $0x50] sm:$0xff]  ;;  %v486_v45 = vld [vmem:[%s3383_s16 + $0x58] sm:$0xff] }
  0xea   : > { %1066 = vmatpush1.bf16.msra.mxu0 %v2514_v47  ;;  %1197 = vmatpush1.bf16.msra.mxu1 %v2515_v48  ;;  %v3454_v47 = vpack.c.bf16 %v455_v43, %v454_v42  ;;  %v499_v48 = vpack.c.bf16 %v486_v45, %v485_v44 }
  0xeb   : > { %1067 = vmatprep.subr.bf16.mxu0 %v2516_v50  ;;  %1198 = vmatprep.subr.bf16.mxu1 %v2518_v52  ;;  %v457_v50 = vld [vmem:[%s3368_s11 + $0x58] sm:$0xff]  ;;  %v487_v52 = vld [vmem:[%s3383_s16 + $0x60] sm:$0xff] }
  0xee   : > { %1068 = vmatpush1.bf16.msra.mxu0 %v2520_v53  ;;  %1199 = vmatpush1.bf16.msra.mxu1 %v2521_v54  ;;  %v488_v53 = vld [vmem:[%s3383_s16 + $0x68] sm:$0xff]  ;;  %v470_v54 = vpack.c.bf16 %v457_v50, %v456_v49 }
  0xef   : > { %1069 = vmatprep.subr.bf16.mxu0 %v2522_v55  ;;  %1200 = vmatprep.subr.bf16.mxu1 %v2524_v56  ;;  %v500_v55 = vpack.c.bf16 %v488_v53, %v487_v52  ;;  %v458_v56 = vld [vmem:[%s3368_s11 + $0x60] sm:$0xff] }
  0xf2   : > { %1070 = vmatpush1.bf16.msra.mxu0 %v2526_v57  ;;  %1201 = vmatpush1.bf16.msra.mxu1 %v2527_v58  ;;  %v459_v57 = vld [vmem:[%s3368_s11 + $0x68] sm:$0xff]  ;;  %v489_v58 = vld [vmem:[%s3383_s16 + $0x70] sm:$0xff] }
  0xf3   : > { %1071 = vmatprep.subr.bf16.mxu0 %v2528_v59  ;;  %1202 = vmatprep.subr.bf16.mxu1 %v2530_v60  ;;  %v490_v59 = vld [vmem:[%s3383_s16 + $0x78] sm:$0xff]  ;;  %v471_v60 = vpack.c.bf16 %v459_v57, %v458_v56 }
  0xf6   : > { %1072 = vmatpush1.bf16.msra.mxu0 %v2532_v61  ;;  %1203 = vmatpush1.bf16.msra.mxu1 %v2533_v62  ;;  %v501_v61 = vpack.c.bf16 %v490_v59, %v489_v58  ;;  %v460_v62 = vld [vmem:[%s3368_s11 + $0x70] sm:$0xff] }
  0xf7   : > { %1073 = vmatprep.subr.bf16.mxu0 %v2534_v63  ;;  %1204 = vmatprep.subr.bf16.mxu1 %v2536_v0  ;;  %v461_v63 = vld [vmem:[%s3368_s11 + $0x78] sm:$0xff]  ;;  %v491_v0 = vld [vmem:[%s3383_s16 + $0x80] sm:$0xff]  ;;  %v1436_v59 = vld [vmem:[%s3386_s21] sm:$0xff] }
  0xfa   : > { %1074 = vmatpush1.bf16.msra.mxu0 %v2538_v1  ;;  %1205 = vmatpush1.bf16.msra.mxu1 %v2539_v2  ;;  %v492_v1 = vld [vmem:[%s3383_s16 + $0x88] sm:$0xff]  ;;  %v472_v2 = vpack.c.bf16 %v461_v63, %v460_v62 }
  0xfb   : > { %2264 = vmatprep.subr.bf16.mxu0 %v2540_v5  ;;  %2340 = vmatprep.subr.bf16.mxu1 %v2540_v5  ;;  %v502_v3 = vpack.c.bf16 %v492_v1, %v491_v0  ;;  %v463_v5 = vld [vmem:[%s3368_s11 + $0x88] sm:$0xff] }
  0xfc   : > { %v473_v7 = vpack.c.bf16 %v463_v5, %v462_v4 }
  0xfd   : > { %1076 = vmatmul.mubr.bf16.vlgmr.msra.gmra.mrb[0].mxu0 %v3406_v8  ;;  %1207 = vmatmul.mubr.bf16.vlgmr.msra.gmra.mrb[0].mxu1 %v3406_v8 }
  0xfe   : > { %2265 = vmatpush3.bf16.msra.mxu0 %v2541_v9  ;;  %2348 = vmatpush3.bf16.msra.mxu1 %v2541_v9  ;;  %v503_v9 = vpack.c.bf16 %v493_v6, %v493_v6 }
  0xff   : > { %1085 = vmatprep.mubr.bf16.mxu0 %v3408_v10  ;;  %1216 = vmatprep.mubr.bf16.mxu1 %v3408_v10 }
 0x100   : > { %2266 = vmatprep.subr.bf16.mxu0 %v2542_v11  ;;  %2341 = vmatprep.subr.bf16.mxu1 %v2542_v11  ;;  %v464_v11 = vld [vmem:[%s3368_s11 + $0x90] sm:$0xff]  ;;  %s3053_s11 = smov [#allocation12]  }
 0x101   : > { %v474_v12 = vpack.c.bf16 %v464_v11, %v464_v11  ;;  %s2936_s15 = sshll.u32 %s3053_s11, 4  ;;  %s2937_s15 = int_to_ptr.vmem [resolvable:$false] %s2936_s15 }
 0x102   : > { %2267 = vmatpush3.bf16.msra.mxu0 %v2543_v14  ;;  %2349 = vmatpush3.bf16.msra.mxu1 %v2543_v14  ;;  %s2938_s29 = scalar_lea.vmem %s2937_s15, 4864  ;;  %p2939_p6 = scmp.lt.s32.totalorder %s4156_s20, %s2937_s15 }
 0x103   : > { %2268 = vmatprep.subr.bf16.mxu0 %v2544_v17  ;;  %2342 = vmatprep.subr.bf16.mxu1 %v2544_v17  ;;  %p2940_p11 = scmp.lt.s32.totalorder %s2938_s29, %s2932_s19 }
 0x105   : > { %1086 = vmatmul.mubr.bf16.gmra.mrb[4].mxu0 %v3418_v18  ;;  %1217 = vmatmul.mubr.bf16.gmra.mrb[4].mxu1 %v3418_v18  ;;  %p2941_p4 = por %p2940_p11, %p2939_p6 }
 0x106   : > { %1095 = vmatprep.mubr.bf16.mxu0 %v3420_v19  ;;  %1226 = vmatprep.mubr.bf16.mxu1 %v3420_v19 }
 0x107   : > { %2269 = vmatpush3.bf16.msra.mxu0 %v2545_v20  ;;  %2350 = vmatpush3.bf16.msra.mxu1 %v2545_v20  ;;  %p2942_p13 = pnand %p2941_p4, %p2935_p1 }
 0x108   : > { %2270 = vmatprep.subr.bf16.mxu0 %v2546_v21  ;;  %2343 = vmatprep.subr.bf16.mxu1 %v2546_v21 }
 0x10b   : > { %2271 = vmatpush3.bf16.msra.mxu0 %v2547_v26  ;;  %2351 = vmatpush3.bf16.msra.mxu1 %v2547_v26 }
 0x10c   : > { %2272 = vmatprep.subr.bf16.mxu0 %v2548_v27  ;;  %2344 = vmatprep.subr.bf16.mxu1 %v2548_v27 }
 0x10d   : > { %1096 = vmatmul.mubr.bf16.gmra.mrb[8].mxu0 %v3430_v28  ;;  %1227 = vmatmul.mubr.bf16.gmra.mrb[8].mxu1 %v3430_v28 }
 0x10e   : > { %1105 = vmatprep.mubr.bf16.mxu0 %v3432_v29  ;;  %1236 = vmatprep.mubr.bf16.mxu1 %v3432_v29 }
 0x10f   : > { %2273 = vmatpush3.bf16.msra.mxu0 %v2549_v30  ;;  %2352 = vmatpush3.bf16.msra.mxu1 %v2549_v30 }
 0x110   : > { %2274 = vmatprep.subr.bf16.mxu0 %v2550_v31  ;;  %2345 = vmatprep.subr.bf16.mxu1 %v2550_v31 }
 0x113   : > { %2275 = vmatpush3.bf16.msra.mxu0 %v2551_v36  ;;  %2353 = vmatpush3.bf16.msra.mxu1 %v2551_v36 }
 0x114   : > { %2276 = vmatprep.subr.bf16.mxu0 %v2552_v37  ;;  %2346 = vmatprep.subr.bf16.mxu1 %v2552_v37 }
 0x115   : > { %1106 = vmatmul.mubr.bf16.gmra.mrb[12].mxu0 %v3442_v38  ;;  %1237 = vmatmul.mubr.bf16.gmra.mrb[12].mxu1 %v3442_v38 }
 0x116   : > { %1115 = vmatprep.mubr.bf16.mxu0 %v3444_v39  ;;  %1246 = vmatprep.mubr.bf16.mxu1 %v3444_v39 }
 0x117   : > { %2277 = vmatpush3.bf16.msra.mxu0 %v2553_v40  ;;  %2354 = vmatpush3.bf16.msra.mxu1 %v2553_v40 }
 0x118   : > { %2278 = vmatprep.subr.bf16.mxu0 %v2554_v41  ;;  %2347 = vmatprep.subr.bf16.mxu1 %v2554_v41 }
 0x11b   : > { %2279 = vmatpush3.bf16.msra.mxu0 %v2555_v46  ;;  %2355 = vmatpush3.bf16.msra.mxu1 %v2555_v46 }
 0x11d   : > { %1116 = vmatmul.mubr.bf16.gmra.mrb[16].mxu0 %v3454_v47  ;;  %1247 = vmatmul.mubr.bf16.gmra.mrb[16].mxu1 %v3454_v47 }
 0x11e   : > { %1125 = vmatprep.mubr.bf16.mxu0 %v499_v48  ;;  %1256 = vmatprep.mubr.bf16.mxu1 %v499_v48 }
 0x125   : > { %1126 = vmatmul.mubr.bf16.gmra.mrb[20].mxu0 %v470_v54  ;;  %1257 = vmatmul.mubr.bf16.gmra.mrb[20].mxu1 %v470_v54 }
 0x126   : > { %1135 = vmatprep.mubr.bf16.mxu0 %v500_v55  ;;  %1266 = vmatprep.mubr.bf16.mxu1 %v500_v55 }
 0x12d   : > { %1136 = vmatmul.mubr.bf16.gmra.mrb[24].mxu0 %v471_v60  ;;  %1267 = vmatmul.mubr.bf16.gmra.mrb[24].mxu1 %v471_v60 }
 0x12e   : > { %1145 = vmatprep.mubr.bf16.mxu0 %v501_v61  ;;  %1276 = vmatprep.mubr.bf16.mxu1 %v501_v61 }
 0x135   : > { %1146 = vmatmul.mubr.bf16.gmra.mrb[28].mxu0 %v472_v2  ;;  %1277 = vmatmul.mubr.bf16.gmra.mrb[28].mxu1 %v472_v2 }
 0x136   : > { %1155 = vmatprep.mubr.bf16.mxu0 %v502_v3  ;;  %1286 = vmatprep.mubr.bf16.mxu1 %v502_v3 }
 0x13d   : > { %1156 = vmatmul.mubr.bf16.gmra.mrb[32].mxu0 %v473_v7  ;;  %1287 = vmatmul.mubr.bf16.gmra.mrb[32].mxu1 %v473_v7 }
 0x13e   : > { %1165 = vmatprep.mubr.bf16.mxu0 %v503_v9  ;;  %1296 = vmatprep.mubr.bf16.mxu1 %v503_v9 }
 0x145   : > { %1166 = vmatmul.mubr.bf16.gmra.mrb[36].mxu0 %v474_v12  ;;  %1297 = vmatmul.mubr.bf16.gmra.mrb[36].mxu1 %v474_v12 }
 0x146   : > { %1337 = vmatprep.mubr.bf16.mxu0 %v3398_v51  ;;  %1377 = vmatprep.mubr.bf16.mxu1 %v499_v48  ;;  %v602_v51 = vlaneseq }
 0x14d   : > { %1338 = vmatmul.mubr.bf16.vlgmr.msra.gmra.mrb[40].mxu0 %v3406_v8  ;;  %1378 = vmatmul.mubr.bf16.vlgmr.msra.gmra.mrb[40].mxu1 %v470_v54  ;;  %v3484_v8 = vshrl.u32 %v602_v51, 7 }
 0x14e   : > { %1345 = vmatprep.mubr.bf16.mxu0 %v3408_v10  ;;  %1385 = vmatprep.mubr.bf16.mxu1 %v500_v55 }
 0x14f   : > { %v612_v10 = vsub.s32 2, %v3484_v8  ;;  %v608_v14 = vsub.s32 1, %v3484_v8  ;;  %v604_v48 = vsub.s32 0, %v3484_v8 }
 0x151   : > { %v3494_v15 = vrot.slane %v3490_v13, %v612_v10  ;;  %v3497_v16 = vrot.slane %v3490_v13, %v608_v14  ;;  %v3534_v0 = vrot.slane %v3490_v13, %v604_v48  ;;  %v1419_v48 = vld [vmem:[%s3376_s14 + $0x10] sm:$0xff] }
 0x155   : > { %1346 = vmatmul.mubr.bf16.gmra.mrb[44].mxu0 %v3418_v18  ;;  %1386 = vmatmul.mubr.bf16.gmra.mrb[44].mxu1 %v471_v60 }
 0x156   : > { %1353 = vmatprep.mubr.bf16.mxu0 %v3420_v19  ;;  %1393 = vmatprep.mubr.bf16.mxu1 %v501_v61  ;;  %v616_v61 = vsub.s32 3, %v3484_v8 }
 0x158   : > { %v3541_v14 = vrot.slane %v3490_v13, %v616_v61 }
 0x15d   : > { %1354 = vmatmul.mubr.bf16.gmra.mrb[48].mxu0 %v3430_v28  ;;  %1394 = vmatmul.mubr.bf16.gmra.mrb[48].mxu1 %v472_v2  ;;  %v1417_v2 = vld [vmem:[%s3376_s14] sm:$0xff] }
 0x15e   : > { %1361 = vmatprep.mubr.bf16.mxu0 %v3432_v29  ;;  %1401 = vmatprep.mubr.bf16.mxu1 %v502_v3 }
 0x165   : > { %1362 = vmatmul.mubr.bf16.gmra.mrb[52].mxu0 %v3442_v38  ;;  %1402 = vmatmul.mubr.bf16.gmra.mrb[52].mxu1 %v473_v7 }
 0x166   : > { %1369 = vmatprep.mubr.bf16.mxu0 %v3444_v39  ;;  %1409 = vmatprep.mubr.bf16.mxu1 %v503_v9 }
 0x16d   : > { %1370 = vmatmul.mubr.bf16.gmra.mrb[56].mxu0 %v3454_v47  ;;  %1410 = vmatmul.mubr.bf16.gmra.mrb[56].mxu1 %v474_v12 }
 0x1d0   : > { %v3499_v17 = vpop.f32.mrb[0].mxu0  ;;  %v1208_v18 = vpop.f32.mrb[0].mxu1 }
 0x1d1   : > { %v1209_v19 = vadd.f32 %v1208_v18, %v3494_v15  ;;  %v1079_v20 = vpop.f32.mrb[1].mxu0  ;;  %v3502_v21 = vpop.f32.mrb[1].mxu1  ;;  %v1437_v18 = vld [vmem:[%s3386_s21 + $0x8] sm:$0xff] }
 0x1d2   : > { %v1080_v22 = vadd.f32 %v1079_v20, %v3497_v16  ;;  %v3505_v23 = vpop.f32.mrb[2].mxu0  ;;  %v1212_v24 = vpop.f32.mrb[2].mxu1  ;;  %v1078_v20 = vadd.f32 %v3499_v17, %v3534_v0  ;;  %v1211_v17 = vadd.f32 %v3502_v21, %v3541_v14 }
 0x1d3   : > { %v1550_v25 = vmul.f32 0.5, %v1209_v19  ;;  %v1213_v26 = vadd.f32 %v1212_v24, %v3494_v15  ;;  %v1083_v27 = vpop.f32.mrb[3].mxu0  ;;  %v3508_v28 = vpop.f32.mrb[3].mxu1  ;;  %v1418_v24 = vld [vmem:[%s3376_s14 + $0x8] sm:$0xff]  ;;  %v1082_v21 = vadd.f32 %v3505_v23, %v3534_v0 }
 0x1d4   : > { %v1455_v29 = vmul.f32 0.5, %v1080_v22  ;;  %v1084_v30 = vadd.f32 %v1083_v27, %v3497_v16  ;;  %v1797_v61 = vmul.f32 0.5, %v1211_v17 }
 0x1d5   : > { %2556 = vtanh.f32 %v1550_v25  ;;  %v1551_v31 = vmul.f32 0.5, %v1213_v26 }
 0x1d6   : > { %2558 = vtanh.f32 %v1455_v29  ;;  %v1456_v32 = vmul.f32 0.5, %v1084_v30 }
 0x1d7   : > { %2560 = vtanh.f32 %v1551_v31 }
 0x1d8   : > { %v3511_v33 = vpop.f32.mrb[4].mxu0  ;;  %v1218_v34 = vpop.f32.mrb[4].mxu1  ;;  %2562 = vtanh.f32 %v1456_v32 }
 0x1d9   : > { %v1219_v35 = vadd.f32 %v1218_v34, %v3494_v15  ;;  %v1089_v36 = vpop.f32.mrb[5].mxu0  ;;  %v3514_v37 = vpop.f32.mrb[5].mxu1 }
 0x1da   : > { %v1090_v38 = vadd.f32 %v1089_v36, %v3497_v16  ;;  %v3517_v39 = vpop.f32.mrb[6].mxu0  ;;  %v1222_v40 = vpop.f32.mrb[6].mxu1 }
 0x1db   : > { %v1552_v41 = vmul.f32 0.5, %v1219_v35  ;;  %v1093_v42 = vpop.f32.mrb[7].mxu0  ;;  %v3519_v43 = vpop.f32.mrb[7].mxu1  ;;  %v1223_v45 = vadd.f32 %v1222_v40, %v3494_v15 }
 0x1dc   : > { %v1457_v44 = vmul.f32 0.5, %v1090_v38  ;;  %v1094_v46 = vadd.f32 %v1093_v42, %v3497_v16 }
 0x1dd   : > { %2564 = vtanh.f32 %v1552_v41  ;;  %v1553_v47 = vmul.f32 0.5, %v1223_v45  ;;  %v1438_v41 = vld [vmem:[%s3386_s21 + $0x10] sm:$0xff] }
 0x1de   : > { %2566 = vtanh.f32 %v1457_v44  ;;  %v1458_v49 = vmul.f32 0.5, %v1094_v46  ;;  %v1664_v46 = vmul.f32 0.5, %v1078_v20  ;;  %v1088_v20 = vadd.f32 %v3511_v33, %v3534_v0 }
 0x1df   : > { %v2557_v50 = vpop.eup %2556  ;;  %2568 = vtanh.f32 %v1553_v47 }
 0x1e0   : > { %v3524_v52 = vpop.f32.mrb[8].mxu0  ;;  %v1228_v53 = vpop.f32.mrb[8].mxu1  ;;  %v1588_v55 = vmul.f32 0.5, %v2557_v50  ;;  %2570 = vtanh.f32 %v1458_v49 }
 0x1e1   : > { %v2559_v54 = vpop.eup %2558  ;;  %v1229_v56 = vadd.f32 %v1228_v53, %v3494_v15  ;;  %v1099_v57 = vpop.f32.mrb[9].mxu0 }
 0x1e2   : > { %v3527_v58 = vpop.f32.mrb[9].mxu1  ;;  %v1493_v60 = vmul.f32 0.5, %v2559_v54  ;;  %v3531_v62 = vpop.f32.mrb[10].mxu0  ;;  %v1607_v1 = vadd.f32 0.5, %v1588_v55  ;;  %v1100_v3 = vadd.f32 %v1099_v57, %v3497_v16 }
 0x1e3   : > { %v1232_v63 = vpop.f32.mrb[10].mxu1  ;;  %v1103_v4 = vpop.f32.mrb[11].mxu0  ;;  %v1554_v9 = vmul.f32 0.5, %v1229_v56 }
 0x1e4   : > { %v3538_v5 = vpop.f32.mrb[11].mxu1  ;;  %v2561_v6 = vpop.eup %2560  ;;  %v1512_v7 = vadd.f32 0.5, %v1493_v60  ;;  %v1626_v12 = vmul.f32 %v1607_v1, %v1436_v59  ;;  %v1459_v25 = vmul.f32 0.5, %v1100_v3  ;;  %v1233_v49 = vadd.f32 %v1232_v63, %v3494_v15 }
 0x1e5   : > { %v2563_v11 = vpop.eup %2562  ;;  %v1589_v51 = vmul.f32 0.5, %v2561_v6  ;;  %2572 = vtanh.f32 %v1554_v9  ;;  %v1215_v63 = vadd.f32 %v3508_v28, %v3541_v14  ;;  %v1420_v9 = vld [vmem:[%s3376_s14 + $0x18] sm:$0xff] }
 0x1e6   : > { %v1531_v10 = vmul.f32 %v1512_v7, %v1417_v2  ;;  %v1494_v19 = vmul.f32 0.5, %v2563_v11  ;;  %2574 = vtanh.f32 %v1459_v25  ;;  %v1439_v2 = vld [vmem:[%s3386_s21 + $0x18] sm:$0xff]  ;;  %v1555_v6 = vmul.f32 0.5, %v1233_v49 }
 0x1e7   : > { %v1608_v22 = vadd.f32 0.5, %v1589_v51  ;;  %v2565_v26 = vpop.eup %2564  ;;  %2576 = vtanh.f32 %v1664_v46  ;;  %v1104_v11 = vadd.f32 %v1103_v4, %v3497_v16  ;;  %v1798_v46 = vmul.f32 0.5, %v1215_v63 }
 0x1e8   : > { %v3547_v27 = vadd.f32 %v1626_v12, %v1531_v10  ;;  %v1513_v29 = vadd.f32 0.5, %v1494_v19  ;;  %v3549_v30 = vpop.f32.mrb[12].mxu0  ;;  %v1238_v31 = vpop.f32.mrb[12].mxu1  ;;  %v1590_v35 = vmul.f32 0.5, %v2565_v26  ;;  %v1665_v12 = vmul.f32 0.5, %v1082_v21  ;;  %v1421_v21 = vld [vmem:[%s3376_s14 + $0x20] sm:$0xff] }
 0x1e9   : > { %v2567_v32 = vpop.eup %2566  ;;  %v1627_v34 = vmul.f32 %v1608_v22, %v1437_v18  ;;  %v1109_v36 = vpop.f32.mrb[13].mxu0  ;;  %2578 = vtanh.f32 %v1555_v6  ;;  %v1460_v28 = vmul.f32 0.5, %v1104_v11  ;;  %v1666_v49 = vmul.f32 0.5, %v1088_v20 }
 0x1ea   : > { %4295 = vst [vmem:[#allocation23_spill] sm:$0xff] %v3547_v27  ;;  %v3551_v38 = vpop.f32.mrb[13].mxu1  ;;  %v1532_v40 = vmul.f32 %v1513_v29, %v1418_v24  ;;  %v1495_v42 = vmul.f32 0.5, %v2567_v32  ;;  %v3556_v44 = vpop.f32.mrb[14].mxu0  ;;  %v1609_v47 = vadd.f32 0.5, %v1590_v35  ;;  %2580 = vtanh.f32 %v1797_v61  ;;  %v1440_v35 = vld [vmem:[%s3386_s21 + $0x20] sm:$0xff] }
 0x1eb   : > { %v1242_v45 = vpop.f32.mrb[14].mxu1  ;;  %v1113_v50 = vpop.f32.mrb[15].mxu0  ;;  %2582 = vtanh.f32 %v1460_v28  ;;  %v1110_v33 = vadd.f32 %v1109_v36, %v3497_v16  ;;  %v1098_v20 = vadd.f32 %v3524_v52, %v3534_v0 }
 0x1ec   : > { %v3560_v53 = vpop.f32.mrb[15].mxu1  ;;  %v2569_v54 = vpop.eup %2568  ;;  %v3564_v55 = vadd.f32 %v1627_v34, %v1532_v40  ;;  %v1514_v56 = vadd.f32 0.5, %v1495_v42  ;;  %v1628_v59 = vmul.f32 %v1609_v47, %v1438_v41  ;;  %v1239_v40 = vadd.f32 %v1238_v31, %v3494_v15 }
 0x1ed   : > { %v2571_v57 = vpop.eup %2570  ;;  %v1591_v60 = vmul.f32 0.5, %v2569_v54  ;;  %2584 = vtanh.f32 %v1665_v12  ;;  %v1221_v54 = vadd.f32 %v3514_v37, %v3541_v14  ;;  %v1092_v31 = vadd.f32 %v3517_v39, %v3534_v0 }
 0x1ee   : > { %4296 = vst [vmem:[#allocation24_spill] sm:$0xff] %v3564_v55  ;;  %v1533_v1 = vmul.f32 %v1514_v56, %v1419_v48  ;;  %v1496_v3 = vmul.f32 0.5, %v2571_v57  ;;  %v1556_v56 = vmul.f32 0.5, %v1239_v40  ;;  %v1461_v57 = vmul.f32 0.5, %v1110_v33 }
 0x1ef   : > { %v1610_v7 = vadd.f32 0.5, %v1591_v60  ;;  %v2573_v23 = vpop.eup %2572  ;;  %v1243_v60 = vadd.f32 %v1242_v45, %v3494_v15  ;;  %v1114_v61 = vadd.f32 %v1113_v50, %v3497_v16  ;;  %v1799_v6 = vmul.f32 0.5, %v1221_v54 }
 0x1f0   : > { %v3571_v51 = vadd.f32 %v1628_v59, %v1533_v1  ;;  %v1515_v10 = vadd.f32 0.5, %v1496_v3  ;;  %v3573_v18 = vpop.f32.mrb[16].mxu0  ;;  %v1248_v19 = vpop.f32.mrb[16].mxu1  ;;  %v1592_v24 = vmul.f32 0.5, %v2573_v23  ;;  %2586 = vtanh.f32 %v1556_v56 }
 0x1f1   : > { %v1629_v22 = vmul.f32 %v1610_v7, %v1439_v2  ;;  %v1119_v25 = vpop.f32.mrb[17].mxu0  ;;  %v3577_v26 = vpop.f32.mrb[17].mxu1  ;;  %2588 = vtanh.f32 %v1461_v57  ;;  %v1557_v63 = vmul.f32 0.5, %v1243_v60  ;;  %v1462_v7 = vmul.f32 0.5, %v1114_v61 }
 0x1f2   : > { %4297 = vst [vmem:[#allocation25_spill] sm:$0xff] %v3571_v51  ;;  %v1534_v4 = vmul.f32 %v1515_v10, %v1420_v9  ;;  %v3579_v29 = vpop.f32.mrb[18].mxu0  ;;  %v3581_v32 = vpop.f32.mrb[18].mxu1  ;;  %v1611_v17 = vadd.f32 0.5, %v1592_v24  ;;  %2590 = vtanh.f32 %v1798_v46  ;;  %v1667_v11 = vmul.f32 0.5, %v1092_v31 }
 0x1f3   : > { %v2575_v34 = vpop.eup %2574  ;;  %v1123_v41 = vpop.f32.mrb[19].mxu0  ;;  %2592 = vtanh.f32 %v1666_v49  ;;  %v1225_v50 = vadd.f32 %v3519_v43, %v3541_v14  ;;  %v1249_v24 = vadd.f32 %v1248_v19, %v3494_v15  ;;  %v1441_v43 = vld [vmem:[%s3386_s21 + $0x28] sm:$0xff]  ;;  %v1668_v19 = vmul.f32 0.5, %v1098_v20 }
 0x1f4   : > { %v3586_v42 = vpop.f32.mrb[19].mxu1  ;;  %v3588_v47 = vadd.f32 %v1629_v22, %v1534_v4  ;;  %v1497_v48 = vmul.f32 0.5, %v2575_v34  ;;  %v1630_v59 = vmul.f32 %v1611_v17, %v1440_v35  ;;  %v2577_v37 = vpop.eup %2576  ;;  %2594 = vtanh.f32 %v1557_v63 }
 0x1f5   : > { %4298 = vst [vmem:[#allocation26_spill] sm:$0xff] %v3586_v42  ;;  %v2579_v45 = vpop.eup %2578  ;;  %2596 = vtanh.f32 %v1462_v7  ;;  %v1120_v35 = vadd.f32 %v1119_v25, %v3497_v16  ;;  %v1558_v33 = vmul.f32 0.5, %v1249_v24  ;;  %v1800_v52 = vmul.f32 0.5, %v1225_v50 }
 0x1f6   : > { %4299 = vst [vmem:[#allocation27_spill] sm:$0xff] %v3588_v47  ;;  %v1516_v36 = vadd.f32 0.5, %v1497_v48  ;;  %v1593_v22 = vmul.f32 0.5, %v2579_v45  ;;  %v2581_v34 = vpop.eup %2580  ;;  %2598 = vtanh.f32 %v1799_v6  ;;  %v620_v56 = vsub.s32 4, %v3484_v8 }
 0x1f7   : > { %v2583_v17 = vpop.eup %2582  ;;  %v1463_v49 = vmul.f32 0.5, %v1120_v35  ;;  %2600 = vtanh.f32 %v1667_v11  ;;  %v1253_v31 = vadd.f32 %v3581_v32, %v3494_v15  ;;  %v1124_v25 = vadd.f32 %v1123_v41, %v3497_v16 }
 0x1f8   : > { %v1535_v1 = vmul.f32 %v1516_v36, %v1421_v21  ;;  %v3597_v2 = vpop.f32.mrb[20].mxu0  ;;  %v3599_v3 = vpop.f32.mrb[20].mxu1  ;;  %v1612_v40 = vadd.f32 0.5, %v1593_v22  ;;  %v1498_v48 = vmul.f32 0.5, %v2583_v17  ;;  %v1422_v21 = vld [vmem:[%s3376_s14 + $0x28] sm:$0xff]  ;;  %2602 = vtanh.f32 %v1558_v33  ;;  %v1423_v33 = vld [vmem:[%s3376_s14 + $0x30] sm:$0xff] }
 0x1f9   : > { %v3601_v9 = vpop.f32.mrb[21].mxu0  ;;  %v3603_v39 = vpop.f32.mrb[21].mxu1  ;;  %v1702_v61 = vmul.f32 0.5, %v2577_v37  ;;  %2604 = vtanh.f32 %v1463_v49  ;;  %v1559_v45 = vmul.f32 0.5, %v1253_v31  ;;  %v1442_v37 = vld [vmem:[%s3386_s21 + $0x30] sm:$0xff]  ;;  %v1464_v24 = vmul.f32 0.5, %v1124_v25 }
 0x1fa   : > { %v3607_v23 = vadd.f32 %v1630_v59, %v1535_v1  ;;  %v3609_v12 = vpop.f32.mrb[22].mxu0  ;;  %v3611_v10 = vpop.f32.mrb[22].mxu1  ;;  %v1631_v54 = vmul.f32 %v1612_v40, %v1441_v43  ;;  %v1517_v57 = vadd.f32 0.5, %v1498_v48  ;;  %v1835_v1 = vmul.f32 0.5, %v2581_v34 }
 0x1fb   : > { %v3616_v28 = vpop.f32.mrb[23].mxu0  ;;  %v3618_v4 = vpop.f32.mrb[23].mxu1  ;;  %2606 = vtanh.f32 %v1800_v52  ;;  %v3648_v52 = vrot.slane %v3490_v13, %v620_v56  ;;  %v1102_v13 = vadd.f32 %v3531_v62, %v3534_v0 }
 0x1fc   : > { %4300 = vst [vmem:[#allocation28_spill] sm:$0xff] %v3607_v23  ;;  %v2585_v46 = vpop.eup %2584  ;;  %v1536_v7 = vmul.f32 %v1517_v57, %v1422_v21  ;;  %2608 = vtanh.f32 %v1668_v19  ;;  %v3652_v49 = vadd.f32 0.5, %v1835_v1 }
 0x1fd   : > { %v2587_v60 = vpop.eup %2586  ;;  %v1703_v20 = vmul.f32 0.5, %v2585_v46  ;;  %2610 = vtanh.f32 %v1559_v45  ;;  %v3650_v46 = vadd.f32 0.5, %v1702_v61  ;;  %v1443_v61 = vld [vmem:[%s3386_s21 + $0x38] sm:$0xff] }
 0x1fe   : > { %v2589_v8 = vpop.eup %2588  ;;  %v1594_v32 = vmul.f32 0.5, %v2587_v60  ;;  %v3644_v17 = vadd.f32 %v1631_v54, %v1536_v7  ;;  %4302 = vst [vmem:[#allocation30_spill] sm:$0xff] %v3652_v49  ;;  %2612 = vtanh.f32 %v1464_v24  ;;  %v1231_v54 = vadd.f32 %v3527_v58, %v3541_v14  ;;  %v1424_v45 = vld [vmem:[%s3376_s14 + $0x38] sm:$0xff] }
 0x1ff   : > { %v2591_v50 = vpop.eup %2590  ;;  %v1499_v22 = vmul.f32 0.5, %v2589_v8  ;;  %v3656_v60 = vadd.f32 0.5, %v1703_v20  ;;  %v1235_v7 = vadd.f32 %v3538_v5, %v3541_v14  ;;  %v1130_v58 = vadd.f32 %v3601_v9, %v3497_v16 }
 0x200   : > { %v3627_v59 = vpop.f32.mrb[24].mxu0  ;;  %v3629_v36 = vpop.f32.mrb[24].mxu1  ;;  %4301 = vst [vmem:[#allocation29_spill] sm:$0xff] %v3644_v17  ;;  %v1613_v40 = vadd.f32 0.5, %v1594_v32  ;;  %v1836_v57 = vmul.f32 0.5, %v2591_v50  ;;  %v1259_v50 = vadd.f32 %v3599_v3, %v3494_v15  ;;  %v1108_v24 = vadd.f32 %v3549_v30, %v3534_v0 }
 0x201   : > { %v3631_v6 = vpop.f32.mrb[25].mxu0  ;;  %v3633_v63 = vpop.f32.mrb[25].mxu1  ;;  %v1518_v19 = vadd.f32 0.5, %v1499_v22  ;;  %4303 = vst [vmem:[#allocation31_spill] sm:$0xff] %v3656_v60  ;;  %v1669_v30 = vmul.f32 0.5, %v1102_v13 }
 0x202   : > { %v3635_v41 = vpop.f32.mrb[26].mxu0  ;;  %v3637_v11 = vpop.f32.mrb[26].mxu1  ;;  %v1632_v31 = vmul.f32 %v1613_v40, %v1442_v37  ;;  %v3684_v9 = vadd.f32 0.5, %v1836_v57  ;;  %v1670_v13 = vmul.f32 0.5, %v1108_v24  ;;  %v1263_v24 = vadd.f32 %v3611_v10, %v3494_v15 }
 0x203   : > { %v3640_v34 = vpop.f32.mrb[27].mxu0  ;;  %v3642_v43 = vpop.f32.mrb[27].mxu1  ;;  %v1537_v56 = vmul.f32 %v1518_v19, %v1423_v33  ;;  %v1801_v19 = vmul.f32 0.5, %v1231_v54  ;;  %v1241_v54 = vadd.f32 %v3551_v38, %v3541_v14 }
 0x204   : > { %v2593_v35 = vpop.eup %2592  ;;  %4305 = vst [vmem:[#allocation33_spill] sm:$0xff] %v3684_v9  ;;  %v1802_v9 = vmul.f32 0.5, %v1235_v7  ;;  %v1112_v7 = vadd.f32 %v3556_v44, %v3534_v0 }
 0x205   : > { %v2595_v48 = vpop.eup %2594  ;;  %v3674_v22 = vmul.f32 0.5, %v2593_v35  ;;  %v3678_v5 = vadd.f32 %v1632_v31, %v1537_v56 }
 0x206   : > { %v2597_v21 = vpop.eup %2596  ;;  %v1595_v25 = vmul.f32 0.5, %v2595_v48  ;;  %v1671_v10 = vmul.f32 0.5, %v1112_v7 }
 0x207   : > { %v1500_v8 = vmul.f32 0.5, %v2597_v21  ;;  %v2599_v1 = vpop.eup %2598  ;;  %4304 = vst [vmem:[#allocation32_spill] sm:$0xff] %v3678_v5  ;;  %v3735_v7 = vadd.f32 0.5, %v3674_v22 }
 0x208   : > { %v1614_v32 = vadd.f32 0.5, %v1595_v25  ;;  %v3668_v20 = vpop.f32.mrb[28].mxu0  ;;  %v3670_v37 = vpop.f32.mrb[28].mxu1  ;;  %v1560_v25 = vmul.f32 0.5, %v1259_v50 }
 0x209   : > { %v3672_v62 = vpop.eup %2600  ;;  %v1519_v40 = vadd.f32 0.5, %v1500_v8  ;;  %v3680_v33 = vpop.f32.mrb[29].mxu0  ;;  %v1465_v8 = vmul.f32 0.5, %v1130_v58  ;;  %v1425_v58 = vld [vmem:[%s3376_s14 + $0x40] sm:$0xff]  ;;  %4309 = vst [vmem:[#allocation37_spill] sm:$0xff] %v3735_v7 }
 0x20a   : > { %v3682_v3 = vpop.f32.mrb[29].mxu1  ;;  %v2603_v48 = vpop.eup %2602  ;;  %v1633_v21 = vmul.f32 %v1614_v32, %v1443_v61  ;;  %v1444_v61 = vld [vmem:[%s3386_s21 + $0x40] sm:$0xff]  ;;  %2614 = vtanh.f32 %v1560_v25 }
 0x20b   : > { %v3686_v17 = vpop.f32.mrb[30].mxu0  ;;  %v3688_v35 = vpop.f32.mrb[30].mxu1  ;;  %v1538_v31 = vmul.f32 %v1519_v40, %v1424_v45  ;;  %v1596_v56 = vmul.f32 0.5, %v2603_v48  ;;  %2616 = vtanh.f32 %v1465_v8  ;;  %v1837_v48 = vmul.f32 0.5, %v2599_v1 }
 0x20c   : > { %v2605_v49 = vpop.eup %2604  ;;  %v3690_v5 = vpop.f32.mrb[31].mxu0  ;;  %2618 = vtanh.f32 %v1801_v19  ;;  %v1426_v19 = vld [vmem:[%s3376_s14 + $0x48] sm:$0xff] }
 0x20d   : > { %v3692_v23 = vpop.f32.mrb[31].mxu1  ;;  %v3694_v57 = vpop.eup %2606  ;;  %v1501_v32 = vmul.f32 0.5, %v2605_v49  ;;  %v3701_v42 = vadd.f32 %v1633_v21, %v1538_v31  ;;  %v1615_v45 = vadd.f32 0.5, %v1596_v56  ;;  %2620 = vtanh.f32 %v1669_v30  ;;  %v1445_v56 = vld [vmem:[%s3386_s21 + $0x48] sm:$0xff] }
 0x20e   : > { %v3699_v50 = vpop.eup %2608  ;;  %2622 = vtanh.f32 %v1802_v9  ;;  %v1803_v21 = vmul.f32 0.5, %v1241_v54  ;;  %v1134_v30 = vadd.f32 %v3616_v28, %v3497_v16  ;;  %v1245_v9 = vadd.f32 %v3560_v53, %v3541_v14 }
 0x20f   : > { %4306 = vst [vmem:[#allocation34_spill] sm:$0xff] %v3701_v42  ;;  %v2611_v40 = vpop.eup %2610  ;;  %v1520_v38 = vadd.f32 0.5, %v1501_v32  ;;  %v1634_v49 = vmul.f32 %v1615_v45, %v1444_v61  ;;  %2624 = vtanh.f32 %v1670_v13  ;;  %v1561_v32 = vmul.f32 0.5, %v1263_v24 }
 0x210   : > { %v2613_v47 = vpop.eup %2612  ;;  %v1597_v25 = vmul.f32 0.5, %v2611_v40  ;;  %v3709_v42 = vpop.f32.mrb[32].mxu0  ;;  %v1118_v40 = vadd.f32 %v3573_v18, %v3534_v0  ;;  %v1466_v28 = vmul.f32 0.5, %v1134_v30  ;;  %v1140_v18 = vadd.f32 %v3631_v6, %v3497_v16 }
 0x211   : > { %v1539_v31 = vmul.f32 %v1520_v38, %v1425_v58  ;;  %v1502_v8 = vmul.f32 0.5, %v2613_v47  ;;  %v3711_v1 = vpop.f32.mrb[32].mxu1  ;;  %v3716_v61 = vpop.f32.mrb[33].mxu0  ;;  %2626 = vtanh.f32 %v1561_v32  ;;  %v1128_v6 = vadd.f32 %v3597_v2, %v3534_v0 }
 0x212   : > { %v1616_v44 = vadd.f32 0.5, %v1597_v25  ;;  %v3718_v45 = vpop.f32.mrb[33].mxu1  ;;  %v3724_v58 = vpop.f32.mrb[34].mxu0  ;;  %2628 = vtanh.f32 %v1803_v21  ;;  %v1467_v30 = vmul.f32 0.5, %v1140_v18  ;;  %v1427_v18 = vld [vmem:[%s3376_s14 + $0x50] sm:$0xff] }
 0x213   : > { %v3722_v47 = vadd.f32 %v1634_v49, %v1539_v31  ;;  %v1521_v54 = vadd.f32 0.5, %v1502_v8  ;;  %v3726_v13 = vpop.f32.mrb[34].mxu1  ;;  %v3730_v25 = vpop.f32.mrb[35].mxu0  ;;  %v1269_v49 = vadd.f32 %v3629_v36, %v3494_v15  ;;  %v3739_v31 = vadd.f32 0.5, %v1837_v48 }
 0x214   : > { %v1635_v38 = vmul.f32 %v1616_v44, %v1445_v56  ;;  %v3732_v24 = vpop.f32.mrb[35].mxu1  ;;  %v1705_v8 = vmul.f32 0.5, %v3672_v62  ;;  %2630 = vtanh.f32 %v1466_v28  ;;  %v2615_v56 = vpop.eup %2614  ;;  %v1804_v44 = vmul.f32 0.5, %v1245_v9 }
 0x215   : > { %4307 = vst [vmem:[#allocation35_spill] sm:$0xff] %v3722_v47  ;;  %4308 = vst [vmem:[#allocation36_spill] sm:$0xff] %v3732_v24  ;;  %v1540_v53 = vmul.f32 %v1521_v54, %v1426_v19  ;;  %2632 = vtanh.f32 %v1671_v10  ;;  %v1562_v22 = vmul.f32 0.5, %v1269_v49  ;;  %v2617_v21 = vpop.eup %2616  ;;  %v1672_v19 = vmul.f32 0.5, %v1118_v40  ;;  %v1446_v10 = vld [vmem:[%s3386_s21 + $0x50] sm:$0xff] }
 0x216   : > { %4310 = vst [vmem:[#allocation38_spill] sm:$0xff] %v3739_v31  ;;  %v1251_v36 = vadd.f32 %v3577_v26, %v3541_v14  ;;  %v1598_v48 = vmul.f32 0.5, %v2615_v56  ;;  %v3748_v62 = vpop.eup %2618  ;;  %v1122_v54 = vadd.f32 %v3579_v29, %v3534_v0  ;;  %v1503_v9 = vmul.f32 0.5, %v2617_v21 }
 0x217   : > { %v3744_v32 = vadd.f32 %v1635_v38, %v1540_v53  ;;  %v1273_v38 = vadd.f32 %v3637_v11, %v3494_v15  ;;  %v3761_v26 = vpop.eup %2620  ;;  %v1838_v53 = vmul.f32 0.5, %v3694_v57  ;;  %2634 = vtanh.f32 %v1562_v22 }
 0x218   : > { %v3757_v28 = vpop.f32.mrb[36].mxu0  ;;  %v3759_v40 = vpop.f32.mrb[36].mxu1  ;;  %v1617_v49 = vadd.f32 0.5, %v1598_v48  ;;  %v1144_v29 = vadd.f32 %v3640_v34, %v3497_v16  ;;  %v1706_v11 = vmul.f32 0.5, %v3699_v50  ;;  %2636 = vtanh.f32 %v1467_v30 }
 0x219   : > { %4311 = vst [vmem:[#allocation39_spill] sm:$0xff] %v3744_v32  ;;  %v3767_v2 = vpop.f32.mrb[37].mxu0  ;;  %v3769_v56 = vpop.f32.mrb[37].mxu1  ;;  %v1522_v32 = vadd.f32 0.5, %v1503_v9  ;;  %v1563_v47 = vmul.f32 0.5, %v1273_v38  ;;  %2638 = vtanh.f32 %v1804_v44  ;;  %v1805_v22 = vmul.f32 0.5, %v1251_v36 }
 0x21a   : > { %4312 = vst [vmem:[#allocation40_spill] sm:$0xff] %v3769_v56  ;;  %v3771_v21 = vpop.eup %2622  ;;  %v1171_v31 = vpop.f32.mrb[38].mxu0  ;;  %v1636_v48 = vmul.f32 %v1617_v49, %v1446_v10  ;;  %v1468_v51 = vmul.f32 0.5, %v1144_v29  ;;  %2640 = vtanh.f32 %v1672_v19  ;;  %v1673_v55 = vmul.f32 0.5, %v1122_v54  ;;  %v1428_v9 = vld [vmem:[%s3376_s14 + $0x58] sm:$0xff] }
 0x21b   : > { %v1302_v24 = vpop.f32.mrb[38].mxu1  ;;  %v3774_v57 = vpop.eup %2624  ;;  %v1674_v56 = vmul.f32 0.5, %v1128_v6  ;;  %v1541_v60 = vmul.f32 %v1522_v32, %v1427_v18  ;;  %v1132_v50 = vadd.f32 %v3609_v12, %v3534_v0  ;;  %2642 = vtanh.f32 %v1563_v47  ;;  %v1447_v47 = vld [vmem:[%s3386_s21 + $0x58] sm:$0xff] }
 0x21c   : > { %4313 = vst [vmem:[#allocation41_spill] sm:$0xff] %v3774_v57  ;;  %v1172_v34 = vpop.f32.mrb[39].mxu0  ;;  %v1303_v7 = vpop.f32.mrb[39].mxu1  ;;  %v1279_v24 = vadd.f32 %v3670_v37, %v3494_v15  ;;  %v1150_v31 = vadd.f32 %v3680_v33, %v3497_v16  ;;  %v3784_v36 = vadd.f32 0.5, %v1705_v8  ;;  %2644 = vtanh.f32 %v1468_v51 }
 0x21d   : > { %v2627_v27 = vpop.eup %2626  ;;  %v3786_v7 = vadd.f32 %v1636_v48, %v1541_v60  ;;  %2646 = vtanh.f32 %v1805_v22  ;;  %v1261_v12 = vadd.f32 %v3603_v39, %v3541_v14  ;;  %v3793_v33 = vadd.f32 0.5, %v1838_v53 }
 0x21e   : > { %v3782_v44 = vpop.eup %2628  ;;  %4315 = vst [vmem:[#allocation43_spill] sm:$0xff] %v3784_v36  ;;  %v1599_v19 = vmul.f32 0.5, %v2627_v27  ;;  %v1564_v30 = vmul.f32 0.5, %v1279_v24  ;;  %v1469_v37 = vmul.f32 0.5, %v1150_v31  ;;  %2648 = vtanh.f32 %v1673_v55 }
 0x21f   : > { %4314 = vst [vmem:[#allocation42_spill] sm:$0xff] %v3782_v44  ;;  %v2631_v32 = vpop.eup %2630  ;;  %4317 = vst [vmem:[#allocation45_spill] sm:$0xff] %v3793_v33  ;;  %v3799_v51 = vadd.f32 0.5, %v1706_v11  ;;  %2650 = vtanh.f32 %v1674_v56  ;;  %v1675_v10 = vmul.f32 0.5, %v1132_v50  ;;  %v1283_v39 = vadd.f32 %v3688_v35, %v3494_v15  ;;  %v1450_v33 = vld [vmem:[%s3386_s21 + $0x70] sm:$0xff] }
 0x220   : > { %v3791_v54 = vpop.eup %2632  ;;  %v1618_v8 = vadd.f32 0.5, %v1599_v19  ;;  %v1504_v6 = vmul.f32 0.5, %v2631_v32  ;;  %v3795_v60 = vpop.f32.mrb[40].mxu0  ;;  %v1265_v18 = vadd.f32 %v3618_v4, %v3541_v14  ;;  %2652 = vtanh.f32 %v1564_v30 }
 0x221   : > { %4316 = vst [vmem:[#allocation44_spill] sm:$0xff] %v3791_v54  ;;  %v3797_v27 = vpop.f32.mrb[40].mxu1  ;;  %4318 = vst [vmem:[#allocation46_spill] sm:$0xff] %v3799_v51  ;;  %v3804_v38 = vpop.f32.mrb[41].mxu0  ;;  %v1839_v22 = vmul.f32 0.5, %v3748_v62  ;;  %v1807_v48 = vmul.f32 0.5, %v1261_v12  ;;  %v1138_v35 = vadd.f32 %v3627_v59, %v3534_v0  ;;  %2654 = vtanh.f32 %v1469_v37 }
 0x222   : > { %v3806_v49 = vpop.f32.mrb[41].mxu1  ;;  %v1637_v53 = vmul.f32 %v1618_v8, %v1447_v47  ;;  %v1523_v55 = vadd.f32 0.5, %v1504_v6  ;;  %v3810_v29 = vpop.f32.mrb[42].mxu0  ;;  %v1271_v19 = vadd.f32 %v3633_v63, %v3541_v14  ;;  %v1565_v32 = vmul.f32 0.5, %v1283_v39  ;;  %v1448_v59 = vld [vmem:[%s3386_s21 + $0x60] sm:$0xff] }
 0x223   : > { %v3812_v11 = vpop.f32.mrb[42].mxu1  ;;  %v2635_v56 = vpop.eup %2634  ;;  %v3826_v62 = vmul.f32 0.5, %v3761_v26  ;;  %2656 = vtanh.f32 %v1675_v10  ;;  %v1154_v30 = vadd.f32 %v3690_v5, %v3497_v16  ;;  %v1808_v6 = vmul.f32 0.5, %v1265_v18 }
 0x224   : > { %v3817_v34 = vpop.f32.mrb[43].mxu0  ;;  %v3819_v50 = vpop.f32.mrb[43].mxu1  ;;  %v1542_v24 = vmul.f32 %v1523_v55, %v1428_v9  ;;  %v1600_v31 = vmul.f32 0.5, %v2635_v56  ;;  %v1429_v55 = vld [vmem:[%s3376_s14 + $0x60] sm:$0xff]  ;;  %2658 = vtanh.f32 %v1565_v32  ;;  %v3836_v39 = vadd.f32 0.5, %v1839_v22 }
 0x225   : > { %v2637_v4 = vpop.eup %2636  ;;  %2660 = vtanh.f32 %v1807_v48  ;;  %v1470_v10 = vmul.f32 0.5, %v1154_v30  ;;  %v1809_v5 = vmul.f32 0.5, %v1271_v19  ;;  %v1142_v22 = vadd.f32 %v3635_v41, %v3534_v0 }
 0x226   : > { %v3823_v47 = vpop.eup %2638  ;;  %v1505_v12 = vmul.f32 0.5, %v2637_v4  ;;  %v3833_v8 = vadd.f32 %v1637_v53, %v1542_v24  ;;  %v1619_v9 = vadd.f32 0.5, %v1600_v31  ;;  %4322 = vst [vmem:[#allocation50_spill] sm:$0xff] %v3836_v39  ;;  %v1676_v4 = vmul.f32 0.5, %v1138_v35  ;;  %v1449_v31 = vld [vmem:[%s3386_s21 + $0x68] sm:$0xff] }
 0x227   : > { %4319 = vst [vmem:[#allocation47_spill] sm:$0xff] %v3823_v47  ;;  %v3831_v37 = vpop.eup %2640  ;;  %2662 = vtanh.f32 %v1470_v10  ;;  %v1275_v30 = vadd.f32 %v3642_v43, %v3541_v14 }
 0x228   : > { %4320 = vst [vmem:[#allocation48_spill] sm:$0xff] %v3831_v37  ;;  %4321 = vst [vmem:[#allocation49_spill] sm:$0xff] %v3833_v8  ;;  %v2643_v63 = vpop.eup %2642  ;;  %v1524_v26 = vadd.f32 0.5, %v1505_v12  ;;  %v1638_v47 = vmul.f32 %v1619_v9, %v1448_v59  ;;  %v3838_v37 = vpop.f32.mrb[44].mxu0  ;;  %2664 = vtanh.f32 %v1808_v6  ;;  %v1430_v12 = vld [vmem:[%s3376_s14 + $0x68] sm:$0xff]  ;;  %v1289_v9 = vadd.f32 %v3711_v1, %v3494_v15 }
 0x229   : > { %v2645_v56 = vpop.eup %2644  ;;  %v1601_v44 = vmul.f32 0.5, %v2643_v63  ;;  %v3840_v53 = vpop.f32.mrb[44].mxu1  ;;  %v1148_v6 = vadd.f32 %v3668_v20, %v3534_v0  ;;  %2666 = vtanh.f32 %v1676_v4  ;;  %v1810_v54 = vmul.f32 0.5, %v1275_v30 }
 0x22a   : > { %v3842_v18 = vpop.eup %2646  ;;  %v1543_v24 = vmul.f32 %v1524_v26, %v1429_v55  ;;  %v1506_v48 = vmul.f32 0.5, %v2645_v56  ;;  %v3847_v32 = vpop.f32.mrb[45].mxu0  ;;  %2668 = vtanh.f32 %v1809_v5  ;;  %v1299_v8 = vadd.f32 %v3759_v40, %v3494_v15 }
 0x22b   : > { %4323 = vst [vmem:[#allocation51_spill] sm:$0xff] %v3842_v18  ;;  %v3849_v35 = vpop.f32.mrb[45].mxu1  ;;  %v3851_v59 = vpop.eup %2648  ;;  %v1620_v19 = vadd.f32 0.5, %v1601_v44  ;;  %v1160_v44 = vadd.f32 %v3716_v61, %v3497_v16  ;;  %v1678_v4 = vmul.f32 0.5, %v1148_v6  ;;  %v1285_v6 = vadd.f32 %v3692_v23, %v3541_v14 }
 0x22c   : > { %4324 = vst [vmem:[#allocation52_spill] sm:$0xff] %v3851_v59  ;;  %v3858_v55 = vpop.f32.mrb[46].mxu0  ;;  %v3860_v41 = vpop.f32.mrb[46].mxu1  ;;  %v3862_v26 = vadd.f32 %v1638_v47, %v1543_v24  ;;  %v1525_v10 = vadd.f32 0.5, %v1506_v48  ;;  %v1281_v59 = vadd.f32 %v3682_v3, %v3541_v14  ;;  %v1566_v47 = vmul.f32 0.5, %v1289_v9 }
 0x22d   : > { %v2651_v63 = vpop.eup %2650  ;;  %v3868_v56 = vpop.f32.mrb[47].mxu0  ;;  %v1639_v18 = vmul.f32 %v1620_v19, %v1449_v31  ;;  %v1677_v48 = vmul.f32 0.5, %v1142_v22  ;;  %v1471_v57 = vmul.f32 0.5, %v1160_v44  ;;  %v1431_v19 = vld [vmem:[%s3376_s14 + $0x70] sm:$0xff]  ;;  %v1152_v3 = vadd.f32 %v3686_v17, %v3534_v0 }
 0x22e   : > { %4325 = vst [vmem:[#allocation53_spill] sm:$0xff] %v3862_v26  ;;  %v3870_v43 = vpop.f32.mrb[47].mxu1  ;;  %v2653_v1 = vpop.eup %2652  ;;  %v1544_v39 = vmul.f32 %v1525_v10, %v1430_v12  ;;  %2670 = vtanh.f32 %v1566_v47  ;;  %v1712_v36 = vmul.f32 0.5, %v2651_v63  ;;  %v1811_v22 = vmul.f32 0.5, %v1281_v59  ;;  %v1451_v59 = vld [vmem:[%s3386_s21 + $0x78] sm:$0xff] }
 0x22f   : > { %v2655_v24 = vpop.eup %2654  ;;  %v1602_v20 = vmul.f32 0.5, %v2653_v1  ;;  %2672 = vtanh.f32 %v1471_v57  ;;  %v1293_v57 = vadd.f32 %v3726_v13, %v3494_v15  ;;  %v1568_v40 = vmul.f32 0.5, %v1299_v8  ;;  %v1452_v8 = vld [vmem:[%s3386_s21 + $0x80] sm:$0xff] }
 0x230   : > { %v1507_v61 = vmul.f32 0.5, %v2655_v24  ;;  %v2657_v51 = vpop.eup %2656  ;;  %v3875_v26 = vadd.f32 %v1639_v18, %v1544_v39  ;;  %v3880_v12 = vpop.f32.mrb[48].mxu0  ;;  %2674 = vtanh.f32 %v1677_v48  ;;  %v1679_v48 = vmul.f32 0.5, %v1152_v3 }
 0x231   : > { %v1621_v31 = vadd.f32 0.5, %v1602_v20  ;;  %v2659_v9 = vpop.eup %2658  ;;  %v3882_v30 = vpop.f32.mrb[48].mxu1  ;;  %v1713_v63 = vmul.f32 0.5, %v2657_v51  ;;  %2676 = vtanh.f32 %v1810_v54  ;;  %v1164_v20 = vadd.f32 %v3730_v25, %v3497_v16 }
 0x232   : > { %4326 = vst [vmem:[#allocation54_spill] sm:$0xff] %v3875_v26  ;;  %v1526_v5 = vadd.f32 0.5, %v1507_v61  ;;  %v2661_v10 = vpop.eup %2660  ;;  %v1603_v18 = vmul.f32 0.5, %v2659_v9  ;;  %v3886_v44 = vpop.f32.mrb[49].mxu0  ;;  %2678 = vtanh.f32 %v1678_v4  ;;  %v1812_v26 = vmul.f32 0.5, %v1285_v6 }
 0x233   : > { %v1640_v39 = vmul.f32 %v1621_v31, %v1450_v33  ;;  %v3888_v17 = vpop.f32.mrb[49].mxu1  ;;  %v3893_v47 = vpop.f32.mrb[50].mxu0  ;;  %2680 = vtanh.f32 %v1811_v22  ;;  %v1158_v4 = vadd.f32 %v3709_v42, %v3534_v0  ;;  %v1472_v3 = vmul.f32 0.5, %v1164_v20 }
 0x234   : > { %v1545_v1 = vmul.f32 %v1526_v5, %v1431_v19  ;;  %v3895_v24 = vpop.f32.mrb[50].mxu1  ;;  %v2663_v33 = vpop.eup %2662  ;;  %v1622_v23 = vadd.f32 0.5, %v1603_v18  ;;  %v1567_v19 = vmul.f32 0.5, %v1293_v57  ;;  %v1432_v5 = vld [vmem:[%s3376_s14 + $0x78] sm:$0xff]  ;;  %v3917_v22 = vadd.f32 0.5, %v3826_v62 }
 0x235   : > { %v3899_v61 = vpop.f32.mrb[51].mxu0  ;;  %v3901_v54 = vpop.f32.mrb[51].mxu1  ;;  %v1508_v13 = vmul.f32 0.5, %v2663_v33  ;;  %v3920_v6 = vmul.f32 0.5, %v3771_v21  ;;  %v3924_v57 = vmul.f32 0.5, %v2661_v10 }
 0x236   : > { %v3903_v51 = vpop.eup %2664  ;;  %v3905_v31 = vadd.f32 %v1640_v39, %v1545_v1  ;;  %v1641_v9 = vmul.f32 %v1622_v23, %v1451_v59  ;;  %2682 = vtanh.f32 %v1567_v19  ;;  %v1170_v39 = vadd.f32 %v3767_v2, %v3497_v16 }
 0x237   : > { %v2667_v18 = vpop.eup %2666  ;;  %v1527_v25 = vadd.f32 0.5, %v1508_v13  ;;  %4327 = vst [vmem:[#allocation55_spill] sm:$0xff] %v3920_v6  ;;  %v3922_v59 = vadd.f32 0.5, %v1712_v36  ;;  %2684 = vtanh.f32 %v1472_v3  ;;  %v3930_v2 = vadd.f32 0.5, %v1713_v63 }
 0x238   : > { %v3914_v1 = vpop.eup %2668  ;;  %2686 = vtanh.f32 %v1679_v48  ;;  %v3926_v33 = vpop.f32.mrb[52].mxu0  ;;  %v1473_v21 = vmul.f32 0.5, %v1170_v39  ;;  %v1714_v10 = vmul.f32 0.5, %v2667_v18  ;;  %v1680_v48 = vmul.f32 0.5, %v1158_v4  ;;  %v1433_v4 = vld [vmem:[%s3376_s14 + $0x80] sm:$0xff] }
 0x239   : > { %v2671_v42 = vpop.eup %2670  ;;  %v1546_v15 = vmul.f32 %v1527_v25, %v1432_v5  ;;  %v3928_v16 = vpop.f32.mrb[52].mxu1  ;;  %2688 = vtanh.f32 %v1812_v26  ;;  %v2282_v25 = vadd.f32 %v3804_v38, %v3795_v60  ;;  %v1291_v18 = vadd.f32 %v3718_v45, %v3541_v14 }
 0x23a   : > { %v1604_v62 = vmul.f32 0.5, %v2671_v42  ;;  %v3932_v23 = vpop.f32.mrb[53].mxu0  ;;  %v3934_v36 = vpop.f32.mrb[53].mxu1  ;;  %2690 = vtanh.f32 %v1568_v40  ;;  %v2285_v40 = vadd.f32 %v3817_v34, %v3810_v29  ;;  %v2288_v6 = vadd.f32 %v3847_v32, %v3838_v37 }
 0x23b   : > { %v2673_v20 = vpop.eup %2672  ;;  %v3936_v13 = vadd.f32 %v1641_v9, %v1546_v15  ;;  %v3939_v19 = vpop.f32.mrb[54].mxu0  ;;  %2692 = vtanh.f32 %v1473_v21  ;;  %v2312_v15 = vadd.f32 %v3806_v49, %v3797_v27  ;;  %v2318_v37 = vadd.f32 %v3849_v35, %v3840_v53  ;;  %v1453_v53 = vld [vmem:[%s3386_s21 + $0x88] sm:$0xff] }
 0x23c   : > { %v3941_v5 = vpop.f32.mrb[54].mxu1  ;;  %v2675_v63 = vpop.eup %2674  ;;  %v1623_v26 = vadd.f32 0.5, %v1604_v62  ;;  %v1509_v3 = vmul.f32 0.5, %v2673_v20  ;;  %v2315_v62 = vadd.f32 %v3819_v50, %v3812_v11  ;;  %v1340_v20 = vadd.f32 %v2282_v25, %v3648_v52 }
 0x23d   : > { %4328 = vst [vmem:[#allocation56_spill] sm:$0xff] %v3936_v13  ;;  %v3945_v39 = vpop.f32.mrb[55].mxu0  ;;  %v3947_v42 = vpop.f32.mrb[55].mxu1  ;;  %2694 = vtanh.f32 %v1680_v48  ;;  %v1380_v45 = vadd.f32 %v2312_v15, %v3648_v52  ;;  %v1343_v27 = vadd.f32 %v2285_v40, %v3648_v52  ;;  %v1162_v11 = vadd.f32 %v3724_v58, %v3534_v0 }
 0x23e   : > { %v3949_v9 = vpop.eup %2676  ;;  %v1642_v38 = vmul.f32 %v1623_v26, %v1452_v8  ;;  %v1528_v21 = vadd.f32 0.5, %v1509_v3  ;;  %v1383_v49 = vadd.f32 %v2315_v62, %v3648_v52  ;;  %2696 = vtanh.f32 %v1340_v20  ;;  %v1434_v20 = vld [vmem:[%s3376_s14 + $0x88] sm:$0xff] }
 0x23f   : > { %v3960_v60 = vpop.eup %2678  ;;  %v1348_v34 = vadd.f32 %v2288_v6, %v3648_v52  ;;  %v3973_v8 = vadd.f32 0.5, %v1714_v10  ;;  %2698 = vtanh.f32 %v1380_v45  ;;  %v2291_v32 = vadd.f32 %v3868_v56, %v3858_v55 }
 0x240   : > { %v3965_v13 = vpop.eup %2680  ;;  %v1547_v29 = vmul.f32 %v1528_v21, %v1433_v4  ;;  %v3979_v48 = vpop.f32.mrb[56].mxu0  ;;  %v1813_v25 = vmul.f32 0.5, %v1291_v18  ;;  %2700 = vtanh.f32 %v1343_v27  ;;  %v1388_v55 = vadd.f32 %v2318_v37, %v3648_v52 }
 0x241   : > { %v2683_v50 = vpop.eup %2682  ;;  %v3981_v26 = vpop.f32.mrb[56].mxu1  ;;  %2702 = vtanh.f32 %v1383_v49  ;;  %v1351_v56 = vadd.f32 %v2291_v32, %v3648_v52  ;;  %v2321_v45 = vadd.f32 %v3870_v43, %v3860_v41  ;;  %v2294_v32 = vadd.f32 %v3886_v44, %v3880_v12  ;;  %v1454_v43 = vld [vmem:[%s3386_s21 + $0x90] sm:$0xff] }
 0x242   : > { %v2685_v3 = vpop.eup %2684  ;;  %v3983_v58 = vadd.f32 %v1642_v38, %v1547_v29  ;;  %v1605_v6 = vmul.f32 0.5, %v2683_v50  ;;  %v3985_v10 = vpop.f32.mrb[57].mxu0  ;;  %v1681_v38 = vmul.f32 0.5, %v1162_v11  ;;  %2704 = vtanh.f32 %v1348_v34 }
 0x243   : > { %v3987_v4 = vpop.f32.mrb[57].mxu1  ;;  %v3989_v15 = vpop.eup %2686  ;;  %v1510_v35 = vmul.f32 0.5, %v2685_v3  ;;  %v1715_v50 = vmul.f32 0.5, %v2675_v63  ;;  %2706 = vtanh.f32 %v1388_v55  ;;  %v1168_v34 = vadd.f32 %v3757_v28, %v3534_v0 }
 0x244   : > { %v3994_v40 = vpop.f32.mrb[58].mxu0  ;;  %v2337_v62 = vpop.f32.mrb[58].mxu1  ;;  %v1624_v21 = vadd.f32 0.5, %v1605_v6  ;;  %2708 = vtanh.f32 %v1351_v56  ;;  %v1356_v55 = vadd.f32 %v2294_v32, %v3648_v52  ;;  %v2324_v12 = vadd.f32 %v3888_v17, %v3882_v30 }
 0x245   : > { %v3996_v18 = vpop.eup %2688  ;;  %v4001_v27 = vpop.f32.mrb[59].mxu0  ;;  %v1529_v37 = vadd.f32 0.5, %v1510_v35  ;;  %2710 = vtanh.f32 %v1813_v25  ;;  %v1435_v35 = vld [vmem:[%s3376_s14 + $0x90] sm:$0xff]  ;;  %v2297_v28 = vadd.f32 %v3899_v61, %v3893_v47  ;;  %v1682_v56 = vmul.f32 0.5, %v1168_v34 }
 0x246   : > { %v2338_v49 = vpop.f32.mrb[59].mxu1  ;;  %v2691_v29 = vpop.eup %2690  ;;  %v1643_v11 = vmul.f32 %v1624_v21, %v1453_v53  ;;  %2712 = vtanh.f32 %v1681_v38  ;;  %v1396_v38 = vadd.f32 %v2324_v12, %v3648_v52  ;;  %v2327_v17 = vadd.f32 %v3901_v54, %v3895_v24 }
 0x247   : > { %v2693_v3 = vpop.eup %2692  ;;  %v1606_v6 = vmul.f32 0.5, %v2691_v29  ;;  %v1548_v41 = vmul.f32 %v1529_v37, %v1434_v20  ;;  %v1391_v49 = vadd.f32 %v2321_v45, %v3648_v52  ;;  %v1359_v30 = vadd.f32 %v2297_v28, %v3648_v52 }
 0x248   : > { %v1511_v62 = vmul.f32 0.5, %v2693_v3  ;;  %v4013_v44 = vpop.eup %2694  ;;  %v2300_v47 = vadd.f32 %v3932_v23, %v3926_v33  ;;  %v2330_v61 = vadd.f32 %v3934_v36, %v3928_v16  ;;  %v1734_v54 = vadd.f32 0.5, %v1715_v50  ;;  %v4331_v16 = vld [vmem:[#allocation24_spill] sm:$0xff]  ;;  %v4332_v36 = vld [vmem:[#allocation37_spill] sm:$0xff] }
 0x249   : > { %v1625_v63 = vadd.f32 0.5, %v1606_v6  ;;  %v4015_v53 = vadd.f32 %v1643_v11, %v1548_v41  ;;  %2714 = vtanh.f32 %v1391_v49  ;;  %v2697_v25 = vpop.eup %2696  ;;  %v4330_v6 = vld [vmem:[#allocation31_spill] sm:$0xff]  ;;  %v1716_v33 = vmul.f32 0.5, %v3960_v60 }
 0x24a   : > { %v1530_v0 = vadd.f32 0.5, %v1511_v62  ;;  %2716 = vtanh.f32 %v1356_v55  ;;  %v2699_v20 = vpop.eup %2698  ;;  %v1759_v29 = vmul.f32 %v2697_v25, %v3650_v46  ;;  %v4329_v46 = vld [vmem:[#allocation23_spill] sm:$0xff]  ;;  %v2303_v60 = vadd.f32 %v3945_v39, %v3939_v19  ;;  %v4334_v55 = vld [vmem:[#allocation25_spill] sm:$0xff] }
 0x24b   : > { %v1644_v21 = vmul.f32 %v1625_v63, %v1454_v43  ;;  %v2701_v37 = vpop.eup %2700  ;;  %v1769_v32 = vmul.f32 %v2699_v20, %v3922_v59  ;;  %2718 = vtanh.f32 %v1396_v38  ;;  %v2333_v25 = vadd.f32 %v3947_v42, %v3941_v5  ;;  %v4337_v20 = vld [vmem:[#allocation27_spill] sm:$0xff] }
 0x24c   : > { %v1549_v45 = vmul.f32 %v1530_v0, %v1435_v35  ;;  %v2703_v3 = vpop.eup %2702  ;;  %v1778_v34 = vadd.f32 %v1759_v29, %v4329_v46  ;;  %v1760_v41 = vmul.f32 %v2701_v37, %v4330_v6  ;;  %2720 = vtanh.f32 %v1359_v30  ;;  %v4335_v0 = vld [vmem:[#allocation43_spill] sm:$0xff]  ;;  %v4339_v46 = vld [vmem:[#allocation41_spill] sm:$0xff] }
 0x24d   : > { %v2705_v24 = vpop.eup %2704  ;;  %2722 = vtanh.f32 %v1682_v56  ;;  %v1788_v59 = vadd.f32 %v1769_v32, %v3786_v7  ;;  %v1770_v43 = vmul.f32 %v2703_v3, %v3930_v2  ;;  %v4333_v7 = vld [vmem:[#allocation49_spill] sm:$0xff]  ;;  %v1399_v19 = vadd.f32 %v2327_v17, %v3648_v52  ;;  %v4338_v32 = vld [vmem:[#allocation46_spill] sm:$0xff] }
 0x24e   : > { %v4029_v11 = vadd.f32 %v1644_v21, %v1549_v45  ;;  %v2707_v62 = vpop.eup %2706  ;;  %2724 = vtanh.f32 %v1778_v34  ;;  %1930 = vst [vmem:[%s4037_s8] sm:$0xff] %v1778_v34  ;;  %v1779_v23 = vadd.f32 %v1760_v41, %v4331_v16  ;;  %v1761_v50 = vmul.f32 %v2705_v24, %v4332_v36 }
 0x24f   : > { %v2709_v49 = vpop.eup %2708  ;;  %2726 = vtanh.f32 %v1788_v59  ;;  %1940 = vst [vmem:[%s4037_s8 + $0x50] sm:$0xff] %v1788_v59  ;;  %v1789_v2 = vadd.f32 %v1770_v43, %v4333_v7  ;;  %v1771_v63 = vmul.f32 %v2707_v62, %v3973_v8  ;;  %v4336_v8 = vld [vmem:[#allocation53_spill] sm:$0xff]  ;;  %v2306_v39 = vadd.f32 %v3985_v10, %v3979_v48 }
 0x250   : > { %v4047_v35 = vpop.eup %2710  ;;  %2728 = vtanh.f32 %v1779_v23  ;;  %1931 = vst [vmem:[%s4037_s8 + $0x8] sm:$0xff] %v1779_v23  ;;  %v1780_v12 = vadd.f32 %v1761_v50, %v4334_v55  ;;  %v1762_v28 = vmul.f32 %v2709_v49, %v4335_v0  ;;  %v1364_v5 = vadd.f32 %v2300_v47, %v3648_v52  ;;  %v4343_v50 = vld [vmem:[#allocation30_spill] sm:$0xff]  ;;  %v4344_v7 = vld [vmem:[#allocation29_spill] sm:$0xff] }
 0x251   : > { %v4054_v56 = vpop.eup %2712  ;;  %2730 = vtanh.f32 %v1789_v2  ;;  %1941 = vst [vmem:[%s4037_s8 + $0x58] sm:$0xff] %v1789_v2  ;;  %v1790_v21 = vadd.f32 %v1771_v63, %v4336_v8  ;;  %v2336_v42 = vadd.f32 %v3987_v4, %v3981_v26  ;;  %v1846_v30 = vmul.f32 0.5, %v3903_v51  ;;  %v4340_v4 = vld [vmem:[#allocation54_spill] sm:$0xff] }
 0x252   : > { %2732 = vtanh.f32 %v1780_v12  ;;  %1932 = vst [vmem:[%s4037_s8 + $0x10] sm:$0xff] %v1780_v12  ;;  %v1781_v45 = vadd.f32 %v1762_v28, %v4337_v20  ;;  %v2309_v48 = vadd.f32 %v4001_v27, %v3994_v40  ;;  %v1847_v10 = vmul.f32 0.5, %v3914_v1  ;;  %v4341_v40 = vld [vmem:[#allocation26_spill] sm:$0xff]  ;;  %v4342_v1 = vld [vmem:[#allocation28_spill] sm:$0xff]  ;;  %v4346_v28 = vld [vmem:[#allocation33_spill] sm:$0xff] }
 0x253   : > { %v2715_v38 = vpop.eup %2714  ;;  %2734 = vtanh.f32 %v1790_v21  ;;  %1942 = vst [vmem:[%s4037_s8 + $0x60] sm:$0xff] %v1790_v21  ;;  %v1735_v37 = vadd.f32 0.5, %v1716_v33  ;;  %v1708_v26 = vmul.f32 0.5, %v4339_v46  ;;  %v1404_v51 = vadd.f32 %v2330_v61, %v3648_v52 }
 0x254   : > { %v2717_v29 = vpop.eup %2716  ;;  %v1772_v17 = vmul.f32 %v2715_v38, %v1734_v54  ;;  %2736 = vtanh.f32 %v1781_v45  ;;  %1933 = vst [vmem:[%s4037_s8 + $0x18] sm:$0xff] %v1781_v45  ;;  %v4078_v27 = vadd.f32 %v4341_v40, %v3541_v14  ;;  %v1864_v59 = vadd.f32 0.5, %v3924_v57 }
 0x255   : > { %v1763_v47 = vmul.f32 %v2717_v29, %v4338_v32  ;;  %v2719_v3 = vpop.eup %2718  ;;  %2738 = vtanh.f32 %v1399_v19  ;;  %v1865_v43 = vadd.f32 0.5, %v1846_v30  ;;  %v1866_v33 = vadd.f32 0.5, %v1847_v10 }
 0x256   : > { %v1791_v34 = vadd.f32 %v1772_v17, %v4340_v4  ;;  %v2721_v6 = vpop.eup %2720  ;;  %v1773_v24 = vmul.f32 %v2719_v3, %v1735_v37  ;;  %2740 = vtanh.f32 %v1364_v5  ;;  %v1367_v23 = vadd.f32 %v2303_v60, %v3648_v52  ;;  %v4345_v60 = vld [vmem:[#allocation36_spill] sm:$0xff]  ;;  %v4347_v5 = vld [vmem:[#allocation38_spill] sm:$0xff] }
 0x257   : > { %v1782_v41 = vadd.f32 %v1763_v47, %v4342_v1  ;;  %v4081_v54 = vpop.eup %2722  ;;  %v1764_v62 = vmul.f32 %v2721_v6, %v3917_v22  ;;  %v1407_v2 = vadd.f32 %v2333_v25, %v3648_v52  ;;  %v1717_v63 = vmul.f32 0.5, %v3989_v15  ;;  %v4348_v17 = vld [vmem:[#allocation40_spill] sm:$0xff] }
 0x258   : > { %2742 = vtanh.f32 %v1791_v34  ;;  %1943 = vst [vmem:[%s4037_s8 + $0x68] sm:$0xff] %v1791_v34  ;;  %v2725_v61 = vpop.eup %2724  ;;  %v1792_v16 = vadd.f32 %v1773_v24, %v3905_v31  ;;  %v1372_v12 = vadd.f32 %v2306_v39, %v3648_v52  ;;  %v1295_v0 = vadd.f32 %v4345_v60, %v3541_v14  ;;  %v4350_v3 = vld [vmem:[#allocation44_spill] sm:$0xff] }
 0x259   : > { %2744 = vtanh.f32 %v1782_v41  ;;  %1934 = vst [vmem:[%s4037_s8 + $0x20] sm:$0xff] %v1782_v41  ;;  %v2727_v36 = vpop.eup %2726  ;;  %v1892_v49 = vmul.f32 %v2725_v61, %v4343_v50  ;;  %v1783_v57 = vadd.f32 %v1764_v62, %v4344_v7  ;;  %v1412_v15 = vadd.f32 %v2336_v42, %v3648_v52  ;;  %v4351_v34 = vld [vmem:[#allocation48_spill] sm:$0xff] }
 0x25a   : > { %2746 = vtanh.f32 %v1404_v51  ;;  %v2729_v22 = vpop.eup %2728  ;;  %v1902_v55 = vmul.f32 %v2727_v36, %v1864_v59  ;;  %1944 = vst [vmem:[%s4037_s8 + $0x70] sm:$0xff] %v1792_v16  ;;  %v1848_v21 = vmul.f32 0.5, %v3949_v9  ;;  %v1375_v39 = vadd.f32 %v2309_v48, %v3648_v52 }
 0x25b   : > { %2748 = vtanh.f32 %v1792_v16  ;;  %v2731_v31 = vpop.eup %2730  ;;  %1911 = vst [vmem:[%s4098_s23] sm:$0xff] %v1892_v49  ;;  %v1893_v25 = vmul.f32 %v2729_v22, %v4346_v28  ;;  %1935 = vst [vmem:[%s4037_s8 + $0x28] sm:$0xff] %v1783_v57  ;;  %v1727_v20 = vadd.f32 0.5, %v1708_v26  ;;  %v1718_v45 = vmul.f32 0.5, %v4013_v44  ;;  %v4349_v44 = vld [vmem:[#allocation45_spill] sm:$0xff]  ;;  %v4353_v16 = vld [vmem:[#allocation50_spill] sm:$0xff] }
 0x25c   : > { %2750 = vtanh.f32 %v1783_v57  ;;  %v2733_v8 = vpop.eup %2732  ;;  %1921 = vst [vmem:[%s4098_s23 + $0x50] sm:$0xff] %v1902_v55  ;;  %v1903_v19 = vmul.f32 %v2731_v31, %v1865_v43  ;;  %v1736_v30 = vadd.f32 0.5, %v1717_v63  ;;  %v1301_v9 = vadd.f32 %v4348_v17, %v3541_v14  ;;  %v4352_v43 = vld [vmem:[#allocation56_spill] sm:$0xff]  ;;  %v4355_v49 = vld [vmem:[#allocation55_spill] sm:$0xff] }
 0x25d   : > { %2752 = vtanh.f32 %v1367_v23  ;;  %v2735_v38 = vpop.eup %2734  ;;  %1912 = vst [vmem:[%s4098_s23 + $0x8] sm:$0xff] %v1893_v25  ;;  %v1894_v29 = vmul.f32 %v2733_v8, %v4347_v5  ;;  %v1849_v52 = vmul.f32 0.5, %v3965_v13  ;;  %v1814_v48 = vmul.f32 0.5, %v1295_v0  ;;  %v4356_v63 = vld [vmem:[#allocation52_spill] sm:$0xff] }
 0x25e   : > { %2754 = vtanh.f32 %v1407_v2  ;;  %v2737_v42 = vpop.eup %2736  ;;  %1922 = vst [vmem:[%s4098_s23 + $0x58] sm:$0xff] %v1903_v19  ;;  %v1904_v10 = vmul.f32 %v2735_v38, %v1866_v33  ;;  %v1709_v46 = vmul.f32 0.5, %v4350_v3  ;;  %v1867_v26 = vadd.f32 0.5, %v1848_v21 }
 0x25f   : > { %2756 = vtanh.f32 %v1372_v12  ;;  %v2739_v37 = vpop.eup %2738  ;;  %1913 = vst [vmem:[%s4098_s23 + $0x10] sm:$0xff] %v1894_v29  ;;  %v1895_v32 = vmul.f32 %v2737_v42, %v4349_v44  ;;  %v1710_v51 = vmul.f32 0.5, %v4351_v34  ;;  %v1806_v6 = vmul.f32 0.5, %v4078_v27  ;;  %v4354_v27 = vld [vmem:[#allocation32_spill] sm:$0xff]  ;;  %v4358_v42 = vld [vmem:[#allocation42_spill] sm:$0xff] }
 0x260   : > { %2758 = vtanh.f32 %v1412_v15  ;;  %v2741_v47 = vpop.eup %2740  ;;  %1923 = vst [vmem:[%s4098_s23 + $0x60] sm:$0xff] %v1904_v10  ;;  %v1774_v4 = vmul.f32 %v2739_v37, %v1736_v30  ;;  %v1737_v40 = vadd.f32 0.5, %v1718_v45  ;;  %v1719_v41 = vmul.f32 0.5, %v4054_v56  ;;  %v4359_v10 = vld [vmem:[#allocation35_spill] sm:$0xff] }
 0x261   : > { %2760 = vtanh.f32 %v1375_v39  ;;  %1914 = vst [vmem:[%s4098_s23 + $0x18] sm:$0xff] %v1895_v32  ;;  %v1765_v13 = vmul.f32 %v2741_v47, %v1727_v20  ;;  %v1815_v24 = vmul.f32 0.5, %v1301_v9  ;;  %v1868_v33 = vadd.f32 0.5, %v1849_v52 }
 0x262   : > { %v2743_v14 = vpop.eup %2742  ;;  %v1793_v62 = vadd.f32 %v1774_v4, %v4352_v43  ;;  %2762 = vtanh.f32 %v1814_v48  ;;  %v1859_v7 = vadd.f32 0.5, %v4355_v49  ;;  %v1720_v57 = vmul.f32 0.5, %v4081_v54  ;;  %v4361_v4 = vld [vmem:[#allocation47_spill] sm:$0xff] }
 0x263   : > { %v2745_v1 = vpop.eup %2744  ;;  %v1905_v59 = vmul.f32 %v2743_v14, %v1867_v26  ;;  %v1784_v36 = vadd.f32 %v1765_v13, %v4354_v27  ;;  %v1728_v22 = vadd.f32 0.5, %v1709_v46  ;;  %v1711_v55 = vmul.f32 0.5, %v4356_v63 }
 0x264   : > { %v2747_v61 = vpop.eup %2746  ;;  %v1896_v23 = vmul.f32 %v2745_v1, %v4353_v16  ;;  %2764 = vtanh.f32 %v1793_v62  ;;  %1945 = vst [vmem:[%s4037_s8 + $0x78] sm:$0xff] %v1793_v62  ;;  %v1738_v60 = vadd.f32 0.5, %v1719_v41  ;;  %v1729_v25 = vadd.f32 0.5, %v1710_v51 }
 0x265   : > { %v2749_v50 = vpop.eup %2748  ;;  %1924 = vst [vmem:[%s4098_s23 + $0x68] sm:$0xff] %v1905_v59  ;;  %v1775_v56 = vmul.f32 %v2747_v61, %v1737_v40  ;;  %2766 = vtanh.f32 %v1784_v36  ;;  %1936 = vst [vmem:[%s4037_s8 + $0x30] sm:$0xff] %v1784_v36  ;;  %v1739_v21 = vadd.f32 0.5, %v1720_v57  ;;  %v1730_v38 = vadd.f32 0.5, %v1711_v55 }
 0x266   : > { %v2751_v2 = vpop.eup %2750  ;;  %1915 = vst [vmem:[%s4098_s23 + $0x20] sm:$0xff] %v1896_v23  ;;  %v1906_v12 = vmul.f32 %v2749_v50, %v1868_v33  ;;  %2768 = vtanh.f32 %v1815_v24  ;;  %v1850_v20 = vmul.f32 0.5, %v3996_v18  ;;  %v1841_v30 = vmul.f32 0.5, %v4358_v42 }
 0x267   : > { %v2753_v31 = vpop.eup %2752  ;;  %v1897_v0 = vmul.f32 %v2751_v2, %v1859_v7  ;;  %v1794_v54 = vadd.f32 %v1775_v56, %v3983_v58  ;;  %2770 = vtanh.f32 %v1806_v6  ;;  %v4357_v58 = vld [vmem:[#allocation34_spill] sm:$0xff]  ;;  %v1851_v32 = vmul.f32 0.5, %v4047_v35 }
 0x268   : > { %v2755_v28 = vpop.eup %2754  ;;  %1925 = vst [vmem:[%s4098_s23 + $0x70] sm:$0xff] %v1906_v12  ;;  %v1766_v15 = vmul.f32 %v2753_v31, %v1728_v22  ;;  %v1869_v44 = vadd.f32 0.5, %v1850_v20  ;;  %v1860_v3 = vadd.f32 0.5, %v1841_v30  ;;  %v1842_v14 = vmul.f32 0.5, %v4361_v4 }
 0x269   : > { %v2757_v8 = vpop.eup %2756  ;;  %1916 = vst [vmem:[%s4098_s23 + $0x28] sm:$0xff] %v1897_v0  ;;  %2772 = vtanh.f32 %v1794_v54  ;;  %1946 = vst [vmem:[%s4037_s8 + $0x80] sm:$0xff] %v1794_v54  ;;  %v1776_v19 = vmul.f32 %v2755_v28, %v1738_v60 }
 0x26a   : > { %v2759_v39 = vpop.eup %2758  ;;  %v1785_v45 = vadd.f32 %v1766_v15, %v4357_v58  ;;  %v1767_v5 = vmul.f32 %v2757_v8, %v1729_v25 }
 0x26b   : > { %v2761_v29 = vpop.eup %2760  ;;  %v1795_v17 = vadd.f32 %v1776_v19, %v4015_v53  ;;  %v1777_v9 = vmul.f32 %v2759_v39, %v1739_v21  ;;  %v4360_v53 = vld [vmem:[#allocation39_spill] sm:$0xff] }
 0x26c   : > { %2774 = vtanh.f32 %v1785_v45  ;;  %1937 = vst [vmem:[%s4037_s8 + $0x38] sm:$0xff] %v1785_v45  ;;  %v1786_v37 = vadd.f32 %v1767_v5, %v4359_v10  ;;  %v1768_v52 = vmul.f32 %v2761_v29, %v1730_v38  ;;  %v2763_v48 = vpop.eup %2762 }
 0x26d   : > { %2776 = vtanh.f32 %v1795_v17  ;;  %1947 = vst [vmem:[%s4037_s8 + $0x88] sm:$0xff] %v1795_v17  ;;  %v1796_v18 = vadd.f32 %v1777_v9, %v4029_v11 }
 0x26e   : > { %2778 = vtanh.f32 %v1786_v37  ;;  %1938 = vst [vmem:[%s4037_s8 + $0x40] sm:$0xff] %v1786_v37  ;;  %v1787_v47 = vadd.f32 %v1768_v52, %v4360_v53  ;;  %v2765_v11 = vpop.eup %2764 }
 0x26f   : > { %2780 = vtanh.f32 %v1796_v18  ;;  %1948 = vst [vmem:[%s4037_s8 + $0x90] sm:$0xff] %v1796_v18  ;;  %v2767_v35 = vpop.eup %2766  ;;  %v1907_v46 = vmul.f32 %v2765_v11, %v1869_v44 }
 0x270   : > { %2782 = vtanh.f32 %v1787_v47  ;;  %1939 = vst [vmem:[%s4037_s8 + $0x48] sm:$0xff] %v1787_v47  ;;  %v2769_v26 = vpop.eup %2768  ;;  %v1898_v34 = vmul.f32 %v2767_v35, %v1860_v3 }
 0x271   : > { %2945 = shalt.err (!%p2942_p13)
}
 0x272   : > { %s2946_s14 = scalar_lea.hbm %s4154_s1, 2432  ;;  %s2950_s21 = scalar_lea.hbm %s4259_s7, 4864 }
 0x273   : > { %p2947_p3 = scmp.ne.s32.totalorder %s4154_s1, %s2946_s14  ;;  %p2951_p0 = scmp.lt.u32.totalorder %s4154_s1, %s4259_s7 }
 0x274   : > { %p2952_p5 = scmp.lt.u32.totalorder %s2950_s21, %s2946_s14  ;;  %p2954_p9 = scmp.lt.u32.totalorder %s2946_s14, %s4154_s1 }
 0x275   : > { %p2948_p2 = pnand %p2947_p3, %p4362_p10 }
 0x276   : > { %p2953_p7 = por %p2952_p5, %p2951_p0 }
 0x277   : > { %p2949_p12 = pneg %p2948_p2 }
 0x278   : > { %p2955_p8 = por %p2954_p9, %p2953_p7 }
 0x27a   : > { %p2956_p1 = pnand %p2955_p8, %p2949_p12 }
 0x27c   : > { %2959 = shalt.err (!%p2956_p1)
}
 0x27d   : > { %s3054_s8 = smov 128   ;;  %s3055_s10 = smov 8   ;;  %v2771_v51 = vpop.eup %2770  ;;  %v1870_v6 = vadd.f32 0.5, %v1851_v32  ;;  %v1852_v40 = vmul.f32 0.5, %v2763_v48  ;;  %1926 = vst [vmem:[%s4098_s23 + $0x78] sm:$0xff] %v1907_v46  ;;  %v4363_v1 = vld [vmem:[#allocation51_spill] sm:$0xff] }
 0x27e   : > { %2374 = dma.vmem_to_hbm [thread:$0]  (%p4362_p10), %s4156_s20, 2432, %s4154_s1, %s1955_s4, %s3054_s8, %s3054_s8, %s3055_s10   ;;  %v2773_v13 = vpop.eup %2772  ;;  %v1843_v41 = vmul.f32 0.5, %v4363_v1  ;;  %v1853_v24 = vmul.f32 0.5, %v2769_v26  ;;  %v1861_v43 = vadd.f32 0.5, %v1842_v14  ;;  %v1844_v62 = vmul.f32 0.5, %v2771_v51 }
 0x27f   : > { %1917 = vst [vmem:[%s4098_s23 + $0x30] sm:$0xff] %v1898_v34  ;;  %v1908_v59 = vmul.f32 %v2773_v13, %v1870_v6  ;;  %v2775_v61 = vpop.eup %2774  ;;  %v1871_v33 = vadd.f32 0.5, %v1852_v40  ;;  %s1968_s20 = sshll.u32 %s4098_s23, 4  ;;  %s4201_s4 = scalar_lea.hbm %s4258_s6, %s2262_s30  ;;  %s4203_s20 = int_to_ptr.vmem [resolvable:$true] %s1968_s20 }
 0x280   : > { %v2777_v16 = vpop.eup %2776  ;;  %v1862_v23 = vadd.f32 0.5, %v1843_v41  ;;  %v1899_v27 = vmul.f32 %v2775_v61, %v1861_v43  ;;  %v1872_v50 = vadd.f32 0.5, %v1853_v24  ;;  %v1863_v57 = vadd.f32 0.5, %v1844_v62  ;;  %s1950_s19 = scalar_lea.sflag [#allocation4], %s3361_s22  ;;  %s2960_s11 = scalar_lea.vmem %s4203_s20, 2432 }
 0x281   : > { %1927 = vst [vmem:[%s4098_s23 + $0x80] sm:$0xff] %v1908_v59  ;;  %v2779_v36 = vpop.eup %2778  ;;  %v1909_v49 = vmul.f32 %v2777_v16, %v1871_v33  ;;  %p2961_p6 = scmp.ne.s32.totalorder %s4203_s20, %s2960_s11  ;;  %s3056_s15 = smov [#allocation11]  }
 0x282   : > { %v2781_v7 = vpop.eup %2780  ;;  %1918 = vst [vmem:[%s4098_s23 + $0x38] sm:$0xff] %v1899_v27  ;;  %v1900_v56 = vmul.f32 %v2779_v36, %v1862_v23  ;;  %s2964_s28 = sshll.u32 %s3056_s15, 4  ;;  %s2965_s28 = int_to_ptr.vmem [resolvable:$false] %s2964_s28 }
 0x283   : > { %v2783_v2 = vpop.eup %2782  ;;  %1928 = vst [vmem:[%s4098_s23 + $0x88] sm:$0xff] %v1909_v49  ;;  %v1910_v22 = vmul.f32 %v2781_v7, %v1872_v50  ;;  %p2962_p11 = pnand %p2961_p6, %p4362_p10  ;;  %s2966_s29 = scalar_lea.vmem %s2965_s28, 4864 }
 0x284   : > { %1919 = vst [vmem:[%s4098_s23 + $0x40] sm:$0xff] %v1900_v56  ;;  %v1901_v63 = vmul.f32 %v2783_v2, %v1863_v57  ;;  %p2967_p13 = scmp.lt.s32.totalorder %s4203_s20, %s2965_s28  ;;  %p2968_p3 = scmp.lt.s32.totalorder %s2966_s29, %s2960_s11 }
 0x285   : > { %1929 = vst [vmem:[%s4098_s23 + $0x90] sm:$0xff] %v1910_v22  ;;  %p2963_p4 = pneg %p2962_p11 }
 0x286   : > { %1920 = vst [vmem:[%s4098_s23 + $0x48] sm:$0xff] %v1901_v63  ;;  %p2969_p2 = por %p2968_p3, %p2967_p13 }
 0x288   : > { %p2970_p12 = pnand %p2969_p2, %p2963_p4 }
 0x28a   : > { %2973 = shalt.err (!%p2970_p12)
}
 0x28b   : > { %s2974_s23 = scalar_lea.hbm %s4201_s4, 2432  ;;  %s2978_s16 = scalar_lea.hbm %s4258_s6, 4864 }
 0x28c   : > { %p2975_p0 = scmp.ne.s32.totalorder %s4201_s4, %s2974_s23  ;;  %p2979_p9 = scmp.lt.u32.totalorder %s4201_s4, %s4258_s6 }
 0x28d   : > { %p2980_p8 = scmp.lt.u32.totalorder %s2978_s16, %s2974_s23  ;;  %p2982_p6 = scmp.lt.u32.totalorder %s2974_s23, %s4201_s4 }
 0x28e   : > { %p2976_p5 = pnand %p2975_p0, %p4362_p10 }
 0x28f   : > { %p2981_p1 = por %p2980_p8, %p2979_p9 }
 0x290   : > { %p2977_p7 = pneg %p2976_p5 }
 0x291   : > { %p2983_p11 = por %p2982_p6, %p2981_p1 }
 0x293   : > { %p2984_p4 = pnand %p2983_p11, %p2977_p7 }
 0x295   : > { %2987 = shalt.err (!%p2984_p4)
}
 0x296   : > { %2373 = dma.vmem_to_hbm [thread:$0]  (%p4362_p10), %s4203_s20, 2432, %s4201_s4, %s1950_s19, %s3054_s8, %s3054_s8, %s3055_s10  }
 0x297 PF: > { %s4364_s12 = sld [smem:[#allocation22_spill]]  ;;  %s1999_s9 = sand.u32 1, %s3030_s24  }
 0x298   : > { %p4366_p3 = scmp.ge.s32.totalorder %s3042_s27, 2  ;;  %s2000_s18 = scalar_lea.sflag [#allocation4], %s1999_s9 }
 0x29d   : > { %p4365_p13 = scmp.ne.s32.totalorder %s4364_s12, 0 }
 0x29f   : > { %p2395_p2 = pnand %p4366_p3, %p4365_p13 }
 0x2a1   : > { %3021 = dma.done.wait (!%p2395_p2), %s2000_s18, 2432  }
 0x2a2   : > { %3023 = vsyncadd (!%p2395_p2), %s2000_s18, 4294964864  ;;  %s2009_s13 = scalar_lea.sflag [#allocation13], %s1999_s9 }
 0x2a3   : > { %3025 = dma.done.wait (!%p2395_p2), %s2009_s13, 2432  }
 0x2a4   : > { %3027 = vsyncadd (!%p2395_p2), %s2009_s13, 4294964864  ;;  %s4367_s27 = sld [smem:[#allocation20_spill]]  ;;  %s4368_s22 = sld [smem:[#allocation21_spill]] }
 0x2a5   : > { %s4369_s24 = smov %s3034_s25  ;;  %s4370_s25 = smov %s3038_s26 }
 0x2aa   : > { %p30_p10 = scmp.ge.s32.totalorder %s4367_s27, 4   ;;  %s4371_s26 = smov %s4368_s22 }
 0x2ac   :  { %32 = sbr.rel (!%p30_p10) target bundleno = 14 (0xe), region = 147 }
 0x2b3   :  { %2014 = vsyncpa [#allocation3], 1 }
 0x2b4   :  { %2016 = vsyncpa [#allocation3 + $0x1], 1 }
 0x2b5   :  { %2017 = vsyncpa [#allocation6], 1 }
 0x2b6   :  { %2019 = vsyncpa [#allocation6 + $0x1], 1 }
 0x2b7   :  { %2020 = vsyncpa [#allocation9], 1 }
 0x2b8   :  { %2022 = vsyncpa [#allocation9 + $0x1], 1 }
 0x2b9   :  { %2023 = vsyncpa [#allocation4], 1 }
 0x2ba   :  { %2025 = vsyncpa [#allocation4 + $0x1], 1 }
 0x2bb   :  { %2026 = vsyncpa [#allocation13], 1 }
 0x2bc   :  { %2028 = vsyncpa [#allocation13 + $0x1], 1 }

</bundles_post_ra>
